<compile_context>
chip_gen: v7x
topology: tpu7x:2x2x1
jax: 0.10.0
libtpu: 0.0.40
codegen_flags: <defaults>
</compile_context>

<pallas_src>
import jax
import jax.numpy as jnp
from jax.experimental import pallas as pl
from jax.experimental.pallas import tpu as pltpu

C_IN = 3       # conv1 in_channels
C1 = 32        # conv1 out_channels
C2 = 64        # conv2 out_channels
KSIZE = 3      # conv1 kernel size
MXU_DTYPE = jnp.bfloat16   # MXU operand dtype (f32 accumulation)


def _fused_conv_conv_kernel(p_ref, mask_ref, w1_ref, w2_ref, b2_ref, o_ref):
    """sigmoid(conv2_1x1(sigmoid(conv1_3x3(x)))) for one image, one store.

    p_ref   : (1, MPAD, KP)  bf16  im2col patches at padded-output resolution;
                                   column K (=27) is the constant-1 bias column.
    mask_ref: (MPAD, 1)      f32   1.0 on interior rows, 0.0 on conv2's
                                   zero-padding border / MPAD row padding.
    w1_ref  : (KP, C1)       bf16  conv1 weight matrix (+ bias row K).
    w2_ref  : (C1, C2P)      bf16  conv2 1x1 weights, Cout zero-padded to 128.
    b2_ref  : (1, C2P)       f32
    o_ref   : (1, MPAD, C2P) f32   flat padded NHWC output, 128-lane dense.
    """
    # conv1 (+ folded bias) as a single MXU matmul, f32 accumulation.
    v1 = jnp.dot(p_ref[0], w1_ref[...], preferred_element_type=jnp.float32)
    # sigmoid, then zero the rows that conv2's padding=1 sees as zeros.
    v2 = jax.nn.sigmoid(v1) * mask_ref[...]
    # conv2 (1x1) + bias + sigmoid.
    v3 = jnp.dot(v2.astype(w2_ref.dtype), w2_ref[...],
                 preferred_element_type=jnp.float32) + b2_ref[...]
    # One contiguous, lane-dense, full-block store (border rows = sigmoid(b2)).
    o_ref[0] = jax.nn.sigmoid(v3)


def fused_double_conv_sigmoid(patches, mask, w1aug, w2mat, b2r):
    n, mpad, kp = patches.shape
    c1 = w1aug.shape[1]
    c2p = w2mat.shape[1]
    return pl.pallas_call(
        _fused_conv_conv_kernel,
        out_shape=jax.ShapeDtypeStruct((n, mpad, c2p), jnp.float32),
        grid_spec=pltpu.PrefetchScalarGridSpec(
            num_scalar_prefetch=0,
            grid=(n,),
            in_specs=[
                pl.BlockSpec((1, mpad, kp), lambda i: (i, 0, 0)),
                pl.BlockSpec((mpad, 1), lambda i: (0, 0)),
                pl.BlockSpec((kp, c1), lambda i: (0, 0)),
                pl.BlockSpec((c1, c2p), lambda i: (0, 0)),
                pl.BlockSpec((1, c2p), lambda i: (0, 0)),
            ],
            out_specs=pl.BlockSpec((1, mpad, c2p), lambda i: (i, 0, 0)),
        ),
        compiler_params=pltpu.CompilerParams(
            dimension_semantics=("parallel",)),
    )(patches, mask, w1aug, w2mat, b2r)


def init_params(key):
    """PyTorch-default-style init for conv1/conv2 (OIHW layout)."""
    k1, k2, k3, k4 = jax.random.split(key, 4)
    fan_in1 = C_IN * KSIZE * KSIZE
    bound1 = 1.0 / jnp.sqrt(fan_in1)
    w1 = jax.random.uniform(k1, (C1, C_IN, KSIZE, KSIZE), jnp.float32,
                            -bound1, bound1)
    b1 = jax.random.uniform(k2, (C1,), jnp.float32, -bound1, bound1)
    fan_in2 = C1
    bound2 = 1.0 / jnp.sqrt(fan_in2)
    w2 = jax.random.uniform(k3, (C2, C1, 1, 1), jnp.float32, -bound2, bound2)
    b2 = jax.random.uniform(k4, (C2,), jnp.float32, -bound2, bound2)
    return w1, b1, w2, b2


def prepare_params(w1, b1, w2, b2):
    """One-time (outside jit) weight layout transforms for the fused kernel."""
    K = KSIZE * KSIZE * C_IN                     # 27
    KP = ((K + 1 + 7) // 8) * 8                  # 32: 27 weights + bias column
    # patch column order is (kh, kw, cin) -> same order in the weight matrix.
    w1mat = jnp.transpose(w1, (2, 3, 1, 0)).reshape(K, C1)
    w1aug = jnp.zeros((KP, C1), jnp.float32)
    w1aug = w1aug.at[:K, :].set(w1mat).at[K, :].set(b1)   # fold conv1 bias
    C2P = ((C2 + 127) // 128) * 128              # 128: lane-dense output
    w2mat = jnp.pad(jnp.transpose(w2.reshape(C2, C1)), ((0, 0), (0, C2P - C2)))
    b2r = jnp.pad(b2, (0, C2P - C2)).reshape(1, C2P)
    return (w1aug.astype(MXU_DTYPE), w2mat.astype(MXU_DTYPE),
            b2r.astype(jnp.float32))


@jax.jit
def model_forward(x_nchw, w1aug, w2mat, b2r):
    N, _, H, W = x_nchw.shape
    HP, WP = H + 2, W + 2                        # conv2(padding=1) output size
    M = HP * WP
    MPAD = ((M + 7) // 8) * 8
    K = KSIZE * KSIZE * C_IN
    KP = w1aug.shape[0]

    # NCHW -> NHWC, pad spatially by 2 (conv1 pad composed with conv2 pad) so
    # im2col is built directly at the padded-output (HP, WP) resolution.
    x = jnp.transpose(x_nchw, (0, 2, 3, 1))
    xpad = jnp.pad(x, ((0, 0), (2, 2), (2, 2), (0, 0)))
    cols = [xpad[:, kh:kh + HP, kw:kw + WP, :]
            for kh in range(KSIZE) for kw in range(KSIZE)]
    cols.append(jnp.ones((N, HP, WP, 1), x.dtype))          # bias column
    patches = jnp.concatenate(cols, axis=-1).reshape(N, M, K + 1)
    patches = jnp.pad(patches, ((0, 0), (0, MPAD - M), (0, KP - (K + 1))))
    patches = patches.astype(MXU_DTYPE)

    # {0,1} column mask: 1 on rows that are real conv1 outputs, 0 on the
    # conv2 zero-padding border and on the MPAD row padding (constant-folded).
    r = jnp.arange(MPAD)
    ii, jj = r // WP, r % WP
    interior = (r < M) & (ii >= 1) & (ii <= H) & (jj >= 1) & (jj <= W)
    mask = interior.astype(jnp.float32).reshape(MPAD, 1)

    out = fused_double_conv_sigmoid(patches, mask, w1aug, w2mat, b2r)
    # Drop lane/row padding and return NCHW to match the PyTorch module.
    out = out[:, :M, :C2].reshape(N, HP, WP, C2)
    return jnp.transpose(out, (0, 3, 1, 2))


def _reference_forward(x, w1, b1, w2, b2):
    dn = ("NCHW", "OIHW", "NCHW")
    v1 = jax.lax.conv_general_dilated(x, w1, (1, 1), ((1, 1), (1, 1)),
                                      dimension_numbers=dn)
    v2 = jax.nn.sigmoid(v1 + b1[None, :, None, None])
    v3 = jax.lax.conv_general_dilated(v2, w2, (1, 1), ((1, 1), (1, 1)),
                                      dimension_numbers=dn)
    return jax.nn.sigmoid(v3 + b2[None, :, None, None])


if __name__ == "__main__":
    key = jax.random.PRNGKey(0)
    kx, kp = jax.random.split(key)
    # Small shapes: batch=2 (>= 2 parallel grid blocks so both v7x TCs work),
    # channel counts fixed by the module (3 -> 32 -> 64), spatial 16x16.
    x1 = jax.random.normal(kx, (2, 3, 16, 16), jnp.float32)
    w1, b1, w2, b2 = init_params(kp)
    w1aug, w2mat, b2r = prepare_params(w1, b1, w2, b2)

    out = model_forward(x1, w1aug, w2mat, b2r)
    jax.block_until_ready(out)
    assert out.shape == (2, 64, 18, 18), out.shape

    # numerical cross-check against XLA's own f32 convolution path;
    # tolerance loosened because the kernel uses bf16 MXU operands (f32 acc).
    ref = _reference_forward(x1, w1, b1, w2, b2)
    err = float(jnp.max(jnp.abs(out - ref)))
    assert err < 3e-2, f"max abs err {err}"
    print("KERNEL_OK")
</pallas_src>

<mosaic_0001>
module attributes {stable_mosaic.version = 11 : i64} {
  func.func @_fused_conv_conv_kernel(%arg0: i32, %arg1: memref<1x328x32xbf16, #tpu.memory_space<vmem>>, %arg2: memref<328x1xf32, #tpu.memory_space<vmem>>, %arg3: memref<32x32xbf16, #tpu.memory_space<vmem>>, %arg4: memref<32x128xbf16, #tpu.memory_space<vmem>>, %arg5: memref<1x128xf32, #tpu.memory_space<vmem>>, %arg6: memref<1x328x128xf32, #tpu.memory_space<vmem>>) attributes {dimension_semantics = [#tpu.dimension_semantics<parallel>], iteration_bounds = array<i64: 2>, scalar_prefetch = 0 : i64, scratch_operands = 0 : i64, tpu.core_type = #tpu.core_type<tc>, window_params = [{transform_indices = @transform_0, window_bounds = array<i64: 1, 328, 32>}, {pipeline_mode = #tpu.pipeline_mode<synchronous>, transform_indices = @transform_1, window_bounds = array<i64: 328, 1>}, {pipeline_mode = #tpu.pipeline_mode<synchronous>, transform_indices = @transform_2, window_bounds = array<i64: 32, 32>}, {pipeline_mode = #tpu.pipeline_mode<synchronous>, transform_indices = @transform_3, window_bounds = array<i64: 32, 128>}, {pipeline_mode = #tpu.pipeline_mode<synchronous>, transform_indices = @transform_4, window_bounds = array<i64: 1, 128>}, {transform_indices = @transform_5, window_bounds = array<i64: 1, 328, 128>}]} {
    %c0 = arith.constant 0 : index
    %c0_0 = arith.constant 0 : index
    %c0_1 = arith.constant 0 : index
    %0 = vector.load %arg1[%c0, %c0_0, %c0_1] : memref<1x328x32xbf16, #tpu.memory_space<vmem>>, vector<1x328x32xbf16>
    %1 = vector.shape_cast %0 : vector<1x328x32xbf16> to vector<328x32xbf16>
    %c0_2 = arith.constant 0 : index
    %c0_3 = arith.constant 0 : index
    %2 = vector.load %arg3[%c0_2, %c0_3] : memref<32x32xbf16, #tpu.memory_space<vmem>>, vector<32x32xbf16>
    %cst = arith.constant dense<0.000000e+00> : vector<328x32xf32>
    %3 = tpu.matmul %1, %2, %cst {dimension_numbers = #tpu.dot_dimension_numbers<[1], [0], [0], [1], [0, 0, 1, 1], [], []>} : vector<328x32xbf16>, vector<32x32xbf16>, vector<328x32xf32> -> vector<328x32xf32>
    %4 = arith.negf %3 : vector<328x32xf32>
    %5 = math.exp %4 : vector<328x32xf32>
    %cst_4 = arith.constant 1.000000e+00 : f32
    %6 = vector.broadcast %cst_4 : f32 to vector<328x32xf32>
    %7 = arith.addf %6, %5 : vector<328x32xf32>
    %8 = arith.divf %6, %7 : vector<328x32xf32>
    %c0_5 = arith.constant 0 : index
    %c0_6 = arith.constant 0 : index
    %9 = vector.load %arg2[%c0_5, %c0_6] : memref<328x1xf32, #tpu.memory_space<vmem>>, vector<328x1xf32>
    %10 = vector.broadcast %9 : vector<328x1xf32> to vector<328x32xf32>
    %11 = arith.mulf %8, %10 : vector<328x32xf32>
    %12 = arith.truncf %11 : vector<328x32xf32> to vector<328x32xbf16>
    %c0_7 = arith.constant 0 : index
    %c0_8 = arith.constant 0 : index
    %13 = vector.load %arg4[%c0_7, %c0_8] : memref<32x128xbf16, #tpu.memory_space<vmem>>, vector<32x128xbf16>
    %cst_9 = arith.constant dense<0.000000e+00> : vector<328x128xf32>
    %14 = tpu.matmul %12, %13, %cst_9 {dimension_numbers = #tpu.dot_dimension_numbers<[1], [0], [0], [1], [0, 0, 1, 1], [], []>} : vector<328x32xbf16>, vector<32x128xbf16>, vector<328x128xf32> -> vector<328x128xf32>
    %c0_10 = arith.constant 0 : index
    %c0_11 = arith.constant 0 : index
    %15 = vector.load %arg5[%c0_10, %c0_11] : memref<1x128xf32, #tpu.memory_space<vmem>>, vector<1x128xf32>
    %16 = vector.broadcast %15 : vector<1x128xf32> to vector<328x128xf32>
    %17 = arith.addf %14, %16 : vector<328x128xf32>
    %18 = arith.negf %17 : vector<328x128xf32>
    %19 = math.exp %18 : vector<328x128xf32>
    %cst_12 = arith.constant 1.000000e+00 : f32
    %20 = vector.broadcast %cst_12 : f32 to vector<328x128xf32>
    %21 = arith.addf %20, %19 : vector<328x128xf32>
    %22 = arith.divf %20, %21 : vector<328x128xf32>
    %c0_13 = arith.constant 0 : index
    %c0_14 = arith.constant 0 : index
    %c0_15 = arith.constant 0 : index
    %23 = vector.load %arg6[%c0_13, %c0_14, %c0_15] : memref<1x328x128xf32, #tpu.memory_space<vmem>>, vector<1x328x128xf32>
    %24 = vector.shape_cast %23 : vector<1x328x128xf32> to vector<328x128xf32>
    %25 = vector.shape_cast %22 : vector<328x128xf32> to vector<1x328x128xf32>
    tpu.vector_store %arg6[%c0_13, %c0_14, %c0_15], %25 {strides = array<i32>} : memref<1x328x128xf32, #tpu.memory_space<vmem>>, vector<1x328x128xf32>,
    return
  }
  func.func @transform_0(%arg0: i32) -> (i32, i32, i32) {
    %c0_i32 = arith.constant 0 : i32
    %c0_i32_0 = arith.constant 0 : i32
    %c0_i32_1 = arith.constant 0 : i32
    return %arg0, %c0_i32, %c0_i32_0 : i32, i32, i32
  }
  func.func @transform_1(%arg0: i32) -> (i32, i32) {
    %c0_i32 = arith.constant 0 : i32
    %c0_i32_0 = arith.constant 0 : i32
    %c0_i32_1 = arith.constant 0 : i32
    return %c0_i32, %c0_i32_0 : i32, i32
  }
  func.func @transform_2(%arg0: i32) -> (i32, i32) {
    %c0_i32 = arith.constant 0 : i32
    %c0_i32_0 = arith.constant 0 : i32
    %c0_i32_1 = arith.constant 0 : i32
    return %c0_i32, %c0_i32_0 : i32, i32
  }
  func.func @transform_3(%arg0: i32) -> (i32, i32) {
    %c0_i32 = arith.constant 0 : i32
    %c0_i32_0 = arith.constant 0 : i32
    %c0_i32_1 = arith.constant 0 : i32
    return %c0_i32, %c0_i32_0 : i32, i32
  }
  func.func @transform_4(%arg0: i32) -> (i32, i32) {
    %c0_i32 = arith.constant 0 : i32
    %c0_i32_0 = arith.constant 0 : i32
    %c0_i32_1 = arith.constant 0 : i32
    return %c0_i32, %c0_i32_0 : i32, i32
  }
  func.func @transform_5(%arg0: i32) -> (i32, i32, i32) {
    %c0_i32 = arith.constant 0 : i32
    %c0_i32_0 = arith.constant 0 : i32
    %c0_i32_1 = arith.constant 0 : i32
    return %arg0, %c0_i32, %c0_i32_0 : i32, i32, i32
  }
}

</mosaic_0001>

<bundles_post_ra>
// kernel: model_forward.1
= control target key start
LH: loop header
LB: loop body
LE: loop exit
PB: predicated region body
PF: predicated region fallthrough
CT: control target
= control target key end

     0   :  { %s2622_s18 = smov 0   ;;  %s3020_s0 = inlined_call_operand.vmem [shape: bf16[2,328,32], index: 0, kind: input, shape index: {}]   ;;  %s3021_s1 = inlined_call_operand.vmem [shape: f32[328,1], index: 1, kind: input, shape index: {}]   ;;  %s3022_s2 = inlined_call_operand.vmem [shape: bf16[32,32], index: 2, kind: input, shape index: {}]   ;;  %s3023_s3 = inlined_call_operand.vmem [shape: bf16[32,128], index: 3, kind: input, shape index: {}]   ;;  %s3024_s4 = inlined_call_operand.vmem [shape: f32[1,128], index: 4, kind: input, shape index: {}]   ;;  %s3025_s5 = inlined_call_operand.vmem [shape: f32[2,328,128], index: 5, kind: output, shape index: {}]  }
   0x1 LB: > { %s1832_s19 = sadd.s32 4294967295, %s2587_s18   ;;  %p1836_p0 = scmp.ge.s32.totalorder %s2587_s18, 1  ;;  %s2587_s18 = sphi %s2622_s18, %s15_s18  }
   0x2   : > { %p187_p1 = scmp.lt.s32.totalorder %s2587_s18, 3 }
   0x4   : > { %p188_p2 = pnand %p1836_p0, %p187_p1 }
   0x5   : > { %v2228_v0 = vld [vmem:[%s3022_s2] sm:$0xff] (!%p188_p2)   ;;  %v2589_v1 = vmov (!%p188_p2), 0.0   ;;  %v2229_v2 = vld [vmem:[%s3022_s2 + $0x8] sm:$0xff] (!%p188_p2)   ;;  %vm2590_vm0 = vmmov (!%p188_p2), 0   ;;  %p215_p3 = scmp.lt.s32.totalorder (!%p188_p2), %s1832_s19, 1  ;;  %v2591_v4 = vmov (!%p188_p2), 0  }
   0x6   : > { %191 = sbr.rel (%p188_p2) target bundleno = 663 (0x297), region = 40  ;;  %2037 = vmatprep.subr.bf16.mxu0 (!%p188_p2), %v2589_v1  ;;  %2125 = vmatprep.subr.bf16.mxu1 (!%p188_p2), %v2589_v1  ;;  %v896_v3 = vld [vmem:[%s3021_s1] sm:$0xff] (!%p188_p2)  ;;  %v898_v5 = vld [vmem:[%s3021_s1 + $0x10] sm:$0xff] (!%p188_p2)  ;;  %v897_v6 = vld [vmem:[%s3021_s1 + $0x8] sm:$0xff] (!%p188_p2)  ;;  %vm386_vm1 = vcmask (!%p188_p2), 261120  }
   0x7   : > { %2038 = vmatpush3.bf16.msra.mxu0 (!%p188_p2), %v2228_v0  ;;  %2041 = vmatprep.mubr.msk.bf16.mxu0 (!%p188_p2), %vm2590_vm0, %v2589_v1  ;;  %v899_v7 = vld [vmem:[%s3021_s1 + $0x18] sm:$0xff] (!%p188_p2)  ;;  %v900_v8 = vld [vmem:[%s3021_s1 + $0x20] sm:$0xff] (!%p188_p2)  ;;  %v901_v10 = vld [vmem:[%s3021_s1 + $0x28] sm:$0xff] (!%p188_p2) }
   0x8   : > { %2039 = vmatprep.subr.bf16.mxu0 (!%p188_p2), %v2589_v1  ;;  %2226 = vset.pattern.permute.xlu0 (!%p188_p2), %v2591_v4  ;;  %v902_v11 = vld [vmem:[%s3021_s1 + $0x30] sm:$0xff] (!%p188_p2)  ;;  %v903_v12 = vld [vmem:[%s3021_s1 + $0x38] sm:$0xff] (!%p188_p2)  ;;  %v904_v14 = vld [vmem:[%s3021_s1 + $0x40] sm:$0xff] (!%p188_p2) }
   0x9   : > { %939 = vperm.xlu0 (!%p188_p2), %2226, %v896_v3   ;;  %2227 = vset.pattern.permute.xlu1 (!%p188_p2), %v2591_v4  ;;  %v905_v15 = vld [vmem:[%s3021_s1 + $0x48] sm:$0xff] (!%p188_p2)  ;;  %v906_v16 = vld [vmem:[%s3021_s1 + $0x50] sm:$0xff] (!%p188_p2)  ;;  %v907_v17 = vld [vmem:[%s3021_s1 + $0x58] sm:$0xff] (!%p188_p2) }
   0xa   : > { %949 = vperm.xlu1 (!%p188_p2), %2227, %v898_v5   ;;  %2129 = vmatprep.mubr.msk.bf16.mxu1 (!%p188_p2), %vm2590_vm0, %v2589_v1  ;;  %v908_v19 = vld [vmem:[%s3021_s1 + $0x60] sm:$0xff] (!%p188_p2)  ;;  %v909_v20 = vld [vmem:[%s3021_s1 + $0x68] sm:$0xff] (!%p188_p2)  ;;  %v910_v21 = vld [vmem:[%s3021_s1 + $0x70] sm:$0xff] (!%p188_p2) }
   0xb   : > { %2040 = vmatpush3.bf16.msra.mxu0 (!%p188_p2), %v2229_v2  ;;  %v911_v22 = vld [vmem:[%s3021_s1 + $0x78] sm:$0xff] (!%p188_p2)  ;;  %v912_v24 = vld [vmem:[%s3021_s1 + $0x80] sm:$0xff] (!%p188_p2)  ;;  %v913_v25 = vld [vmem:[%s3021_s1 + $0x88] sm:$0xff] (!%p188_p2) }
   0xc   : > { %v914_v26 = vld [vmem:[%s3021_s1 + $0x90] sm:$0xff] (!%p188_p2)  ;;  %v915_v27 = vld [vmem:[%s3021_s1 + $0x98] sm:$0xff] (!%p188_p2)  ;;  %v916_v29 = vld [vmem:[%s3021_s1 + $0xa0] sm:$0xff] (!%p188_p2) }
   0xd   : > { %s3027_s19 = smov (!%p215_p3, %s1832_s19), 1  ;;  %944 = vperm.xlu0 %2226, %v897_v6   ;;  %v917_v30 = vld [vmem:[%s3021_s1 + $0xa8] sm:$0xff]  ;;  %v918_v31 = vld [vmem:[%s3021_s1 + $0xb0] sm:$0xff]  ;;  %v919_v32 = vld [vmem:[%s3021_s1 + $0xb8] sm:$0xff] }
   0xe   : > { %s2213_s30 = smul.u32 164, %s3027_s19  ;;  %954 = vperm.xlu1 %2227, %v899_v7   ;;  %v920_v34 = vld [vmem:[%s3021_s1 + $0xc0] sm:$0xff]  ;;  %v921_v35 = vld [vmem:[%s3021_s1 + $0xc8] sm:$0xff]  ;;  %v922_v36 = vld [vmem:[%s3021_s1 + $0xd0] sm:$0xff] }
   0xf   : > { %v923_v37 = vld [vmem:[%s3021_s1 + $0xd8] sm:$0xff]  ;;  %v924_v39 = vld [vmem:[%s3021_s1 + $0xe0] sm:$0xff]  ;;  %v925_v40 = vld [vmem:[%s3021_s1 + $0xe8] sm:$0xff]  ;;  %s2214_s26 = smul.u32 328, %s3027_s19 }
  0x10   : > { %s2661_s10 = scalar_lea.vmem %s3020_s0, %s2213_s30  ;;  %v926_v41 = vld [vmem:[%s3021_s1 + $0xf0] sm:$0xff]  ;;  %v927_v42 = vld [vmem:[%s3021_s1 + $0xf8] sm:$0xff]  ;;  %v928_v44 = vld [vmem:[%s3021_s1 + $0x100] sm:$0xff] }
  0x11   : > { %v2230_v9 = vld [vmem:[%s2661_s10] sm:$0xff]   ;;  %959 = vperm.xlu0 %2226, %v900_v8   ;;  %v2231_v13 = vld [vmem:[%s2661_s10 + $0x8] sm:$0xff]   ;;  %v2232_v18 = vld [vmem:[%s2661_s10 + $0x10] sm:$0xff]   ;;  %s2940_s29 = scalar_lea.vmem %s3025_s5, %s2214_s26 }
  0x12   : > { %2042 = vmatmul.mubr.msk.bf16.vlgmr.msra.gmra.mrb[0].mxu0 %vm386_vm1, %v2230_v9  ;;  %964 = vperm.xlu1 %2227, %v901_v10   ;;  %v2233_v23 = vld [vmem:[%s2661_s10 + $0x18] sm:$0xff]   ;;  %v2234_v28 = vld [vmem:[%s2661_s10 + $0x20] sm:$0xff]   ;;  %v2235_v33 = vld [vmem:[%s2661_s10 + $0x28] sm:$0xff]  }
  0x13   : > { %2045 = vmatprep.mubr.msk.bf16.mxu0 %vm2590_vm0, %v2589_v1  ;;  %v2236_v38 = vld [vmem:[%s2661_s10 + $0x30] sm:$0xff]   ;;  %v2237_v43 = vld [vmem:[%s2661_s10 + $0x38] sm:$0xff]   ;;  %v929_v45 = vld [vmem:[%s3021_s1 + $0x108] sm:$0xff] }
  0x14   : > { %v930_v46 = vld [vmem:[%s3021_s1 + $0x110] sm:$0xff]  ;;  %v931_v47 = vld [vmem:[%s3021_s1 + $0x118] sm:$0xff]  ;;  %v2238_v48 = vld [vmem:[%s2661_s10 + $0x40] sm:$0xff]  }
  0x15   : > { %969 = vperm.xlu0 %2226, %v902_v11   ;;  %v932_v49 = vld [vmem:[%s3021_s1 + $0x120] sm:$0xff]  ;;  %v933_v50 = vld [vmem:[%s3021_s1 + $0x128] sm:$0xff]  ;;  %v934_v51 = vld [vmem:[%s3021_s1 + $0x130] sm:$0xff] }
  0x16   : > { %974 = vperm.xlu1 %2227, %v903_v12   ;;  %v935_v52 = vld [vmem:[%s3021_s1 + $0x138] sm:$0xff]  ;;  %v2239_v53 = vld [vmem:[%s2661_s10 + $0x48] sm:$0xff]   ;;  %v936_v54 = vld [vmem:[%s3021_s1 + $0x140] sm:$0xff] }
  0x17   : > { %v2240_v55 = vld [vmem:[%s2661_s10 + $0x50] sm:$0xff]   ;;  %v2241_v56 = vld [vmem:[%s2661_s10 + $0x58] sm:$0xff]   ;;  %v2242_v57 = vld [vmem:[%s2661_s10 + $0x60] sm:$0xff]  }
  0x18   : > { %v2243_v58 = vld [vmem:[%s2661_s10 + $0x68] sm:$0xff]   ;;  %v2251_v59 = vld [vmem:[%s3023_s3] sm:$0xff]   ;;  %v2244_v60 = vld [vmem:[%s2661_s10 + $0x70] sm:$0xff]  }
  0x19   : > { %979 = vperm.xlu0 %2226, %v904_v14   ;;  %2126 = vmatpush3.bf16.msra.mxu1 %v2251_v59  ;;  %v2252_v61 = vld [vmem:[%s3023_s3 + $0x8] sm:$0xff]   ;;  %v2245_v62 = vld [vmem:[%s2661_s10 + $0x78] sm:$0xff]   ;;  %v2246_v63 = vld [vmem:[%s2661_s10 + $0x80] sm:$0xff]  }
  0x1a   : > { %2046 = vmatmul.mubr.msk.bf16.gmra.mrb[4].mxu0 %vm386_vm1, %v2231_v13  ;;  %984 = vperm.xlu1 %2227, %v905_v15   ;;  %v2247_v0 = vld [vmem:[%s2661_s10 + $0x88] sm:$0xff]   ;;  %v2248_v2 = vld [vmem:[%s2661_s10 + $0x90] sm:$0xff]   ;;  %v2249_v3 = vld [vmem:[%s2661_s10 + $0x98] sm:$0xff]  }
  0x1b   : > { %2049 = vmatprep.mubr.msk.bf16.mxu0 %vm2590_vm0, %v2589_v1  ;;  %2127 = vmatprep.subr.bf16.mxu1 %v2589_v1  ;;  %v2250_v4 = vld [vmem:[%s2661_s10 + $0xa0] ss:$0 sps:$4 sm:$0xff]  }
  0x1d   : > { %989 = vperm.xlu0 %2226, %v906_v16   ;;  %2128 = vmatpush3.bf16.msra.mxu1 %v2252_v61 }
  0x1e   : > { %994 = vperm.xlu1 %2227, %v907_v17  }
  0x21   : > { %999 = vperm.xlu0 %2226, %v908_v19  }
  0x22   : > { %2050 = vmatmul.mubr.msk.bf16.gmra.mrb[8].mxu0 %vm386_vm1, %v2232_v18  ;;  %1004 = vperm.xlu1 %2227, %v909_v20  }
  0x23   : > { %2053 = vmatprep.mubr.msk.bf16.mxu0 %vm2590_vm0, %v2589_v1 }
  0x25   : > { %1009 = vperm.xlu0 %2226, %v910_v21  }
  0x26   : > { %1014 = vperm.xlu1 %2227, %v911_v22  }
  0x29   : > { %1019 = vperm.xlu0 %2226, %v912_v24  }
  0x2a   : > { %2054 = vmatmul.mubr.msk.bf16.gmra.mrb[12].mxu0 %vm386_vm1, %v2233_v23  ;;  %1024 = vperm.xlu1 %2227, %v913_v25  }
  0x2b   : > { %2057 = vmatprep.mubr.msk.bf16.mxu0 %vm2590_vm0, %v2589_v1 }
  0x2d   : > { %1029 = vperm.xlu0 %2226, %v914_v26  }
  0x2e   : > { %1034 = vperm.xlu1 %2227, %v915_v27  }
  0x31   : > { %1039 = vperm.xlu0 %2226, %v916_v29  }
  0x32   : > { %2058 = vmatmul.mubr.msk.bf16.gmra.mrb[16].mxu0 %vm386_vm1, %v2234_v28  ;;  %1044 = vperm.xlu1 %2227, %v917_v30  }
  0x33   : > { %2061 = vmatprep.mubr.msk.bf16.mxu0 %vm2590_vm0, %v2589_v1 }
  0x35   : > { %1049 = vperm.xlu0 %2226, %v918_v31  }
  0x36   : > { %1054 = vperm.xlu1 %2227, %v919_v32  }
  0x39   : > { %1059 = vperm.xlu0 %2226, %v920_v34  }
  0x3a   : > { %2062 = vmatmul.mubr.msk.bf16.gmra.mrb[20].mxu0 %vm386_vm1, %v2235_v33  ;;  %1064 = vperm.xlu1 %2227, %v921_v35  }
  0x3b   : > { %2065 = vmatprep.mubr.msk.bf16.mxu0 %vm2590_vm0, %v2589_v1 }
  0x3d   : > { %1069 = vperm.xlu0 %2226, %v922_v36  }
  0x3e   : > { %1074 = vperm.xlu1 %2227, %v923_v37  }
  0x41   : > { %1079 = vperm.xlu0 %2226, %v924_v39  }
  0x42   : > { %2066 = vmatmul.mubr.msk.bf16.gmra.mrb[24].mxu0 %vm386_vm1, %v2236_v38  ;;  %1084 = vperm.xlu1 %2227, %v925_v40  }
  0x43   : > { %2069 = vmatprep.mubr.msk.bf16.mxu0 %vm2590_vm0, %v2589_v1 }
  0x45   : > { %1089 = vperm.xlu0 %2226, %v926_v41  }
  0x46   : > { %1094 = vperm.xlu1 %2227, %v927_v42  }
  0x49   : > { %1099 = vperm.xlu0 %2226, %v928_v44  }
  0x4a   : > { %2070 = vmatmul.mubr.msk.bf16.gmra.mrb[28].mxu0 %vm386_vm1, %v2237_v43  ;;  %1104 = vperm.xlu1 %2227, %v929_v45  }
  0x4b   : > { %2073 = vmatprep.mubr.msk.bf16.mxu0 %vm2590_vm0, %v2589_v1 }
  0x4d   : > { %1109 = vperm.xlu0 %2226, %v930_v46  }
  0x4e   : > { %1114 = vperm.xlu1 %2227, %v931_v47  }
  0x51   : > { %1119 = vperm.xlu0 %2226, %v932_v49  }
  0x52   : > { %2074 = vmatmul.mubr.msk.bf16.gmra.mrb[32].mxu0 %vm386_vm1, %v2238_v48  ;;  %1124 = vperm.xlu1 %2227, %v933_v50  }
  0x53   : > { %2077 = vmatprep.mubr.msk.bf16.mxu0 %vm2590_vm0, %v2589_v1 }
  0x55   : > { %1129 = vperm.xlu0 %2226, %v934_v51  }
  0x56   : > { %1134 = vperm.xlu1 %2227, %v935_v52  }
  0x59   : > { %1139 = vperm.xlu0 %2226, %v936_v54  }
  0x5a   : > { %2078 = vmatmul.mubr.msk.bf16.gmra.mrb[36].mxu0 %vm386_vm1, %v2239_v53 }
  0x5b   : > { %2081 = vmatprep.mubr.msk.bf16.mxu0 %vm2590_vm0, %v2589_v1 }
  0x62   : > { %2082 = vmatmul.mubr.msk.bf16.gmra.mrb[40].mxu0 %vm386_vm1, %v2240_v55 }
  0x63   : > { %2085 = vmatprep.mubr.msk.bf16.mxu0 %vm2590_vm0, %v2589_v1 }
  0x6a   : > { %2086 = vmatmul.mubr.msk.bf16.gmra.mrb[44].mxu0 %vm386_vm1, %v2241_v56 }
  0x6b   : > { %2089 = vmatprep.mubr.msk.bf16.mxu0 %vm2590_vm0, %v2589_v1 }
  0x72   : > { %2090 = vmatmul.mubr.msk.bf16.gmra.mrb[48].mxu0 %vm386_vm1, %v2242_v57 }
  0x73   : > { %2093 = vmatprep.mubr.msk.bf16.mxu0 %vm2590_vm0, %v2589_v1 }
  0x7a   : > { %2094 = vmatmul.mubr.msk.bf16.gmra.mrb[52].mxu0 %vm386_vm1, %v2243_v58 }
  0x7b   : > { %2097 = vmatprep.mubr.msk.bf16.mxu0 %vm2590_vm0, %v2589_v1 }
  0x82   : > { %2098 = vmatmul.mubr.msk.bf16.gmra.mrb[56].mxu0 %vm386_vm1, %v2244_v60 }
  0x83   : > { %2101 = vmatprep.mubr.msk.bf16.mxu0 %vm2590_vm0, %v2589_v1 }
  0x88   : > { %v940_v28 = vpop.permute.xlu0 %939 }
  0x89   : > { %v950_v44 = vpop.permute.xlu1 %949 }
  0x8a   : > { %2102 = vmatmul.mubr.msk.bf16.gmra.mrb[60].mxu0 %vm386_vm1, %v2245_v62 }
  0x8b   : > { %2105 = vmatprep.mubr.msk.bf16.mxu0 %vm2590_vm0, %v2589_v1 }
  0x8c   : > { %v945_v40 = vpop.permute.xlu0 %944 }
  0x8d   : > { %v955_v57 = vpop.permute.xlu1 %954 }
  0x92   : > { %2106 = vmatmul.mubr.msk.bf16.gmra.mrb[64].mxu0 %vm386_vm1, %v2246_v63 }
  0x93   : > { %2109 = vmatprep.mubr.msk.bf16.mxu0 %vm2590_vm0, %v2589_v1 }
  0x9a   : > { %2110 = vmatmul.mubr.msk.bf16.gmra.mrb[68].mxu0 %vm386_vm1, %v2247_v0 }
  0x9b   : > { %2113 = vmatprep.mubr.msk.bf16.mxu0 %vm2590_vm0, %v2589_v1 }
  0xa2   : > { %2114 = vmatmul.mubr.msk.bf16.gmra.mrb[72].mxu0 %vm386_vm1, %v2248_v2 }
  0xa3   : > { %2117 = vmatprep.mubr.msk.bf16.mxu0 %vm2590_vm0, %v2589_v1 }
  0xaa   : > { %2118 = vmatmul.mubr.msk.bf16.gmra.mrb[76].mxu0 %vm386_vm1, %v2249_v3 }
  0xab   : > { %2121 = vmatprep.mubr.msk.bf16.mxu0 %vm2590_vm0, %v2589_v1 }
  0xb2   : > { %2122 = vmatmul.mubr.msk.bf16.gmra.mrb[80].mxu0 %vm386_vm1, %v2250_v4 }
  0xe5   : > { %v484_v5 = vpop.f32.mrb[0].mxu0 }
  0xe6   : > { %v1883_v6 = vmul.f32 -1.442695, %v484_v5  ;;  %v2043_v7 = vpop.f32.mrb[1].mxu0 }
  0xe7   : > { %v487_v8 = vpop.f32.mrb[2].mxu0 }
  0xe8   : > { %2253 = vpow2.f32 %v1883_v6  ;;  %v1884_v9 = vmul.f32 -1.442695, %v487_v8  ;;  %v2044_v10 = vpop.f32.mrb[3].mxu0 }
  0xe9   : > { %v960_v10 = vpop.permute.xlu0 %959 }
  0xea   : > { %2255 = vpow2.f32 %v1884_v9 }
  0xed   : > { %v492_v11 = vpop.f32.mrb[4].mxu0 }
  0xee   : > { %v1885_v12 = vmul.f32 -1.442695, %v492_v11  ;;  %v2047_v13 = vpop.f32.mrb[5].mxu0  ;;  %v965_v11 = vpop.permute.xlu1 %964 }
  0xef   : > { %v495_v14 = vpop.f32.mrb[6].mxu0 }
  0xf0   : > { %2257 = vpow2.f32 %v1885_v12  ;;  %v1886_v15 = vmul.f32 -1.442695, %v495_v14  ;;  %v2048_v16 = vpop.f32.mrb[7].mxu0 }
  0xf2   : > { %v2254_v17 = vpop.eup %2253  ;;  %2259 = vpow2.f32 %v1886_v15 }
  0xf3   : > { %v773_v18 = vadd.f32 1.0, %v2254_v17 }
  0xf4   : > { %v2256_v19 = vpop.eup %2255 }
  0xf5   : > { %2261 = vrcp.f32 %v773_v18  ;;  %v774_v20 = vadd.f32 1.0, %v2256_v19  ;;  %v500_v21 = vpop.f32.mrb[8].mxu0 }
  0xf6   : > { %v1887_v22 = vmul.f32 -1.442695, %v500_v21  ;;  %v2051_v23 = vpop.f32.mrb[9].mxu0 }
  0xf7   : > { %2263 = vrcp.f32 %v774_v20  ;;  %v503_v24 = vpop.f32.mrb[10].mxu0 }
  0xf8   : > { %2265 = vpow2.f32 %v1887_v22  ;;  %v1888_v25 = vmul.f32 -1.442695, %v503_v24  ;;  %v2052_v26 = vpop.f32.mrb[11].mxu0 }
  0xfa   : > { %v2258_v27 = vpop.eup %2257  ;;  %2267 = vpow2.f32 %v1888_v25 }
  0xfb   : > { %v775_v29 = vadd.f32 1.0, %v2258_v27  ;;  %v970_v27 = vpop.permute.xlu0 %969 }
  0xfc   : > { %v2260_v30 = vpop.eup %2259 }
  0xfd   : > { %2269 = vrcp.f32 %v775_v29  ;;  %v776_v31 = vadd.f32 1.0, %v2260_v30  ;;  %v508_v32 = vpop.f32.mrb[12].mxu0 }
  0xfe   : > { %v1889_v33 = vmul.f32 -1.442695, %v508_v32  ;;  %v2055_v34 = vpop.f32.mrb[13].mxu0 }
  0xff   : > { %v2262_v35 = vpop.eup %2261  ;;  %2271 = vrcp.f32 %v776_v31  ;;  %v511_v36 = vpop.f32.mrb[14].mxu0 }
 0x100   : > { %2273 = vpow2.f32 %v1889_v33  ;;  %v1890_v37 = vmul.f32 -1.442695, %v511_v36  ;;  %v2056_v38 = vpop.f32.mrb[15].mxu0  ;;  %v1142_v42 = vmul.f32 %v2262_v35, %v940_v28  ;;  %v975_v28 = vpop.permute.xlu1 %974 }
 0x101   : > { %v2264_v39 = vpop.eup %2263 }
 0x102   : > { %v2266_v41 = vpop.eup %2265  ;;  %2275 = vpow2.f32 %v1890_v37  ;;  %v1143_v43 = vmul.f32 %v2264_v39, %v945_v40 }
 0x103   : > { %v777_v45 = vadd.f32 1.0, %v2266_v41 }
 0x104   : > { %v2268_v46 = vpop.eup %2267  ;;  %v1183_v47 = vpack.c.bf16 %v1143_v43, %v1142_v42 }
 0x105   : > { %2277 = vrcp.f32 %v777_v45  ;;  %v778_v48 = vadd.f32 1.0, %v2268_v46  ;;  %v516_v49 = vpop.f32.mrb[16].mxu0  ;;  %v985_v45 = vpop.permute.xlu1 %984 }
 0x106   : > { %v1891_v50 = vmul.f32 -1.442695, %v516_v49  ;;  %v2059_v51 = vpop.f32.mrb[17].mxu0  ;;  %2130 = vmatmul.mubr.msk.bf16.vlgmr.msra.gmra.mrb[0].mxu1 %vm386_vm1, %v1183_v47 }
 0x107   : > { %v2270_v52 = vpop.eup %2269  ;;  %2279 = vrcp.f32 %v778_v48  ;;  %v519_v53 = vpop.f32.mrb[18].mxu0  ;;  %2133 = vmatprep.mubr.msk.bf16.mxu1 %vm2590_vm0, %v2589_v1 }
 0x108   : > { %2281 = vpow2.f32 %v1891_v50  ;;  %v1892_v54 = vmul.f32 -1.442695, %v519_v53  ;;  %v2060_v55 = vpop.f32.mrb[19].mxu0  ;;  %v1144_v59 = vmul.f32 %v2270_v52, %v950_v44  ;;  %v980_v44 = vpop.permute.xlu0 %979 }
 0x109   : > { %v2272_v56 = vpop.eup %2271 }
 0x10a   : > { %v2274_v58 = vpop.eup %2273  ;;  %2283 = vpow2.f32 %v1892_v54  ;;  %v1145_v60 = vmul.f32 %v2272_v56, %v955_v57 }
 0x10b   : > { %v779_v61 = vadd.f32 1.0, %v2274_v58 }
 0x10c   : > { %v2276_v62 = vpop.eup %2275  ;;  %v1184_v63 = vpack.c.bf16 %v1145_v60, %v1144_v59 }
 0x10d   : > { %2285 = vrcp.f32 %v779_v61  ;;  %v780_v0 = vadd.f32 1.0, %v2276_v62  ;;  %v524_v2 = vpop.f32.mrb[20].mxu0  ;;  %v990_v61 = vpop.permute.xlu0 %989 }
 0x10e   : > { %v1893_v3 = vmul.f32 -1.442695, %v524_v2  ;;  %v2063_v4 = vpop.f32.mrb[21].mxu0  ;;  %2134 = vmatmul.mubr.msk.bf16.gmra.mrb[4].mxu1 %vm386_vm1, %v1184_v63  ;;  %v995_v62 = vpop.permute.xlu1 %994 }
 0x10f   : > { %v2278_v5 = vpop.eup %2277  ;;  %2287 = vrcp.f32 %v780_v0  ;;  %v527_v6 = vpop.f32.mrb[22].mxu0  ;;  %2137 = vmatprep.mubr.msk.bf16.mxu1 %vm2590_vm0, %v2589_v1 }
 0x110   : > { %2289 = vpow2.f32 %v1893_v3  ;;  %v1894_v7 = vmul.f32 -1.442695, %v527_v6  ;;  %v2064_v8 = vpop.f32.mrb[23].mxu0  ;;  %v1146_v13 = vmul.f32 %v2278_v5, %v960_v10 }
 0x111   : > { %v2280_v9 = vpop.eup %2279 }
 0x112   : > { %v2282_v12 = vpop.eup %2281  ;;  %2291 = vpow2.f32 %v1894_v7  ;;  %v1147_v14 = vmul.f32 %v2280_v9, %v965_v11 }
 0x113   : > { %v781_v15 = vadd.f32 1.0, %v2282_v12 }
 0x114   : > { %v2284_v16 = vpop.eup %2283  ;;  %v1185_v17 = vpack.c.bf16 %v1147_v14, %v1146_v13 }
 0x115   : > { %2293 = vrcp.f32 %v781_v15  ;;  %v782_v18 = vadd.f32 1.0, %v2284_v16  ;;  %v532_v19 = vpop.f32.mrb[24].mxu0  ;;  %v1000_v15 = vpop.permute.xlu0 %999 }
 0x116   : > { %v1895_v20 = vmul.f32 -1.442695, %v532_v19  ;;  %v2067_v21 = vpop.f32.mrb[25].mxu0  ;;  %2138 = vmatmul.mubr.msk.bf16.gmra.mrb[8].mxu1 %vm386_vm1, %v1185_v17  ;;  %v1005_v16 = vpop.permute.xlu1 %1004 }
 0x117   : > { %v2286_v22 = vpop.eup %2285  ;;  %2295 = vrcp.f32 %v782_v18  ;;  %v535_v23 = vpop.f32.mrb[26].mxu0  ;;  %2141 = vmatprep.mubr.msk.bf16.mxu1 %vm2590_vm0, %v2589_v1 }
 0x118   : > { %2297 = vpow2.f32 %v1895_v20  ;;  %v1896_v24 = vmul.f32 -1.442695, %v535_v23  ;;  %v2068_v25 = vpop.f32.mrb[27].mxu0  ;;  %v1148_v30 = vmul.f32 %v2286_v22, %v970_v27 }
 0x119   : > { %v2288_v26 = vpop.eup %2287 }
 0x11a   : > { %v2290_v29 = vpop.eup %2289  ;;  %2299 = vpow2.f32 %v1896_v24  ;;  %v1149_v31 = vmul.f32 %v2288_v26, %v975_v28 }
 0x11b   : > { %v783_v32 = vadd.f32 1.0, %v2290_v29 }
 0x11c   : > { %v2292_v33 = vpop.eup %2291  ;;  %v1186_v34 = vpack.c.bf16 %v1149_v31, %v1148_v30 }
 0x11d   : > { %2301 = vrcp.f32 %v783_v32  ;;  %v784_v35 = vadd.f32 1.0, %v2292_v33  ;;  %v540_v36 = vpop.f32.mrb[28].mxu0  ;;  %v1010_v32 = vpop.permute.xlu0 %1009 }
 0x11e   : > { %v1897_v37 = vmul.f32 -1.442695, %v540_v36  ;;  %v2071_v38 = vpop.f32.mrb[29].mxu0  ;;  %2142 = vmatmul.mubr.msk.bf16.gmra.mrb[12].mxu1 %vm386_vm1, %v1186_v34  ;;  %v1015_v33 = vpop.permute.xlu1 %1014 }
 0x11f   : > { %v2294_v39 = vpop.eup %2293  ;;  %2303 = vrcp.f32 %v784_v35  ;;  %v543_v40 = vpop.f32.mrb[30].mxu0  ;;  %2145 = vmatprep.mubr.msk.bf16.mxu1 %vm2590_vm0, %v2589_v1 }
 0x120   : > { %2305 = vpow2.f32 %v1897_v37  ;;  %v1898_v41 = vmul.f32 -1.442695, %v543_v40  ;;  %v2072_v42 = vpop.f32.mrb[31].mxu0  ;;  %v1150_v47 = vmul.f32 %v2294_v39, %v980_v44 }
 0x121   : > { %v2296_v43 = vpop.eup %2295 }
 0x122   : > { %v2298_v46 = vpop.eup %2297  ;;  %2307 = vpow2.f32 %v1898_v41  ;;  %v1151_v48 = vmul.f32 %v2296_v43, %v985_v45 }
 0x123   : > { %v785_v49 = vadd.f32 1.0, %v2298_v46 }
 0x124   : > { %v2300_v50 = vpop.eup %2299  ;;  %v1187_v51 = vpack.c.bf16 %v1151_v48, %v1150_v47 }
 0x125   : > { %2309 = vrcp.f32 %v785_v49  ;;  %v786_v52 = vadd.f32 1.0, %v2300_v50  ;;  %v548_v53 = vpop.f32.mrb[32].mxu0  ;;  %v1020_v49 = vpop.permute.xlu0 %1019 }
 0x126   : > { %v1899_v54 = vmul.f32 -1.442695, %v548_v53  ;;  %v2075_v55 = vpop.f32.mrb[33].mxu0  ;;  %2146 = vmatmul.mubr.msk.bf16.gmra.mrb[16].mxu1 %vm386_vm1, %v1187_v51  ;;  %v1025_v50 = vpop.permute.xlu1 %1024 }
 0x127   : > { %v2302_v56 = vpop.eup %2301  ;;  %2311 = vrcp.f32 %v786_v52  ;;  %v551_v57 = vpop.f32.mrb[34].mxu0  ;;  %2149 = vmatprep.mubr.msk.bf16.mxu1 %vm2590_vm0, %v2589_v1 }
 0x128   : > { %2313 = vpow2.f32 %v1899_v54  ;;  %v1900_v58 = vmul.f32 -1.442695, %v551_v57  ;;  %v2076_v59 = vpop.f32.mrb[35].mxu0  ;;  %v1152_v0 = vmul.f32 %v2302_v56, %v990_v61 }
 0x129   : > { %v2304_v60 = vpop.eup %2303 }
 0x12a   : > { %v2306_v63 = vpop.eup %2305  ;;  %2315 = vpow2.f32 %v1900_v58  ;;  %v1153_v2 = vmul.f32 %v2304_v60, %v995_v62 }
 0x12b   : > { %v787_v3 = vadd.f32 1.0, %v2306_v63 }
 0x12c   : > { %v2308_v4 = vpop.eup %2307  ;;  %v1188_v5 = vpack.c.bf16 %v1153_v2, %v1152_v0 }
 0x12d   : > { %2317 = vrcp.f32 %v787_v3  ;;  %v788_v6 = vadd.f32 1.0, %v2308_v4  ;;  %v556_v7 = vpop.f32.mrb[36].mxu0  ;;  %v1030_v3 = vpop.permute.xlu0 %1029 }
 0x12e   : > { %v1901_v8 = vmul.f32 -1.442695, %v556_v7  ;;  %v2079_v9 = vpop.f32.mrb[37].mxu0  ;;  %2150 = vmatmul.mubr.msk.bf16.gmra.mrb[20].mxu1 %vm386_vm1, %v1188_v5  ;;  %v1035_v4 = vpop.permute.xlu1 %1034 }
 0x12f   : > { %v2310_v10 = vpop.eup %2309  ;;  %2319 = vrcp.f32 %v788_v6  ;;  %v559_v11 = vpop.f32.mrb[38].mxu0  ;;  %2153 = vmatprep.mubr.msk.bf16.mxu1 %vm2590_vm0, %v2589_v1 }
 0x130   : > { %2321 = vpow2.f32 %v1901_v8  ;;  %v1902_v12 = vmul.f32 -1.442695, %v559_v11  ;;  %v2080_v13 = vpop.f32.mrb[39].mxu0  ;;  %v1154_v18 = vmul.f32 %v2310_v10, %v1000_v15 }
 0x131   : > { %v2312_v14 = vpop.eup %2311 }
 0x132   : > { %v2314_v17 = vpop.eup %2313  ;;  %2323 = vpow2.f32 %v1902_v12  ;;  %v1155_v19 = vmul.f32 %v2312_v14, %v1005_v16 }
 0x133   : > { %v789_v20 = vadd.f32 1.0, %v2314_v17 }
 0x134   : > { %v2316_v21 = vpop.eup %2315  ;;  %v1189_v22 = vpack.c.bf16 %v1155_v19, %v1154_v18 }
 0x135   : > { %2325 = vrcp.f32 %v789_v20  ;;  %v790_v23 = vadd.f32 1.0, %v2316_v21  ;;  %v564_v24 = vpop.f32.mrb[40].mxu0  ;;  %v1040_v20 = vpop.permute.xlu0 %1039 }
 0x136   : > { %v1903_v25 = vmul.f32 -1.442695, %v564_v24  ;;  %v2083_v26 = vpop.f32.mrb[41].mxu0  ;;  %2154 = vmatmul.mubr.msk.bf16.gmra.mrb[24].mxu1 %vm386_vm1, %v1189_v22  ;;  %v1045_v21 = vpop.permute.xlu1 %1044 }
 0x137   : > { %v2318_v27 = vpop.eup %2317  ;;  %2327 = vrcp.f32 %v790_v23  ;;  %v567_v28 = vpop.f32.mrb[42].mxu0  ;;  %2157 = vmatprep.mubr.msk.bf16.mxu1 %vm2590_vm0, %v2589_v1 }
 0x138   : > { %2329 = vpow2.f32 %v1903_v25  ;;  %v1904_v29 = vmul.f32 -1.442695, %v567_v28  ;;  %v2084_v30 = vpop.f32.mrb[43].mxu0  ;;  %v1156_v35 = vmul.f32 %v2318_v27, %v1010_v32 }
 0x139   : > { %v2320_v31 = vpop.eup %2319 }
 0x13a   : > { %v2322_v34 = vpop.eup %2321  ;;  %2331 = vpow2.f32 %v1904_v29  ;;  %v1157_v36 = vmul.f32 %v2320_v31, %v1015_v33 }
 0x13b   : > { %v791_v37 = vadd.f32 1.0, %v2322_v34 }
 0x13c   : > { %v2324_v38 = vpop.eup %2323  ;;  %v1190_v39 = vpack.c.bf16 %v1157_v36, %v1156_v35 }
 0x13d   : > { %2333 = vrcp.f32 %v791_v37  ;;  %v792_v40 = vadd.f32 1.0, %v2324_v38  ;;  %v572_v41 = vpop.f32.mrb[44].mxu0  ;;  %v1050_v37 = vpop.permute.xlu0 %1049 }
 0x13e   : > { %v1905_v42 = vmul.f32 -1.442695, %v572_v41  ;;  %v2087_v43 = vpop.f32.mrb[45].mxu0  ;;  %2158 = vmatmul.mubr.msk.bf16.gmra.mrb[28].mxu1 %vm386_vm1, %v1190_v39  ;;  %v1055_v38 = vpop.permute.xlu1 %1054 }
 0x13f   : > { %v2326_v44 = vpop.eup %2325  ;;  %2335 = vrcp.f32 %v792_v40  ;;  %v575_v45 = vpop.f32.mrb[46].mxu0  ;;  %2161 = vmatprep.mubr.msk.bf16.mxu1 %vm2590_vm0, %v2589_v1 }
 0x140   : > { %2337 = vpow2.f32 %v1905_v42  ;;  %v1906_v46 = vmul.f32 -1.442695, %v575_v45  ;;  %v2088_v47 = vpop.f32.mrb[47].mxu0  ;;  %v1158_v52 = vmul.f32 %v2326_v44, %v1020_v49 }
 0x141   : > { %v2328_v48 = vpop.eup %2327 }
 0x142   : > { %v2330_v51 = vpop.eup %2329  ;;  %2339 = vpow2.f32 %v1906_v46  ;;  %v1159_v53 = vmul.f32 %v2328_v48, %v1025_v50 }
 0x143   : > { %v793_v54 = vadd.f32 1.0, %v2330_v51 }
 0x144   : > { %v2332_v55 = vpop.eup %2331  ;;  %v1191_v56 = vpack.c.bf16 %v1159_v53, %v1158_v52 }
 0x145   : > { %2341 = vrcp.f32 %v793_v54  ;;  %v794_v57 = vadd.f32 1.0, %v2332_v55  ;;  %v580_v58 = vpop.f32.mrb[48].mxu0  ;;  %v1060_v54 = vpop.permute.xlu0 %1059 }
 0x146   : > { %v1907_v59 = vmul.f32 -1.442695, %v580_v58  ;;  %v2091_v60 = vpop.f32.mrb[49].mxu0  ;;  %2162 = vmatmul.mubr.msk.bf16.gmra.mrb[32].mxu1 %vm386_vm1, %v1191_v56  ;;  %v1065_v55 = vpop.permute.xlu1 %1064 }
 0x147   : > { %v2334_v61 = vpop.eup %2333  ;;  %2343 = vrcp.f32 %v794_v57  ;;  %v583_v62 = vpop.f32.mrb[50].mxu0  ;;  %2165 = vmatprep.mubr.msk.bf16.mxu1 %vm2590_vm0, %v2589_v1 }
 0x148   : > { %2345 = vpow2.f32 %v1907_v59  ;;  %v1908_v63 = vmul.f32 -1.442695, %v583_v62  ;;  %v2092_v0 = vpop.f32.mrb[51].mxu0  ;;  %v1160_v6 = vmul.f32 %v2334_v61, %v1030_v3 }
 0x149   : > { %v2336_v2 = vpop.eup %2335 }
 0x14a   : > { %v2338_v5 = vpop.eup %2337  ;;  %2347 = vpow2.f32 %v1908_v63  ;;  %v1161_v7 = vmul.f32 %v2336_v2, %v1035_v4 }
 0x14b   : > { %v795_v8 = vadd.f32 1.0, %v2338_v5 }
 0x14c   : > { %v2340_v9 = vpop.eup %2339  ;;  %v1192_v10 = vpack.c.bf16 %v1161_v7, %v1160_v6 }
 0x14d   : > { %2349 = vrcp.f32 %v795_v8  ;;  %v796_v11 = vadd.f32 1.0, %v2340_v9  ;;  %v588_v12 = vpop.f32.mrb[52].mxu0  ;;  %v1070_v8 = vpop.permute.xlu0 %1069 }
 0x14e   : > { %v1909_v13 = vmul.f32 -1.442695, %v588_v12  ;;  %v2095_v14 = vpop.f32.mrb[53].mxu0  ;;  %2166 = vmatmul.mubr.msk.bf16.gmra.mrb[36].mxu1 %vm386_vm1, %v1192_v10  ;;  %v1075_v9 = vpop.permute.xlu1 %1074 }
 0x14f   : > { %v2342_v15 = vpop.eup %2341  ;;  %2351 = vrcp.f32 %v796_v11  ;;  %v591_v16 = vpop.f32.mrb[54].mxu0  ;;  %2169 = vmatprep.mubr.msk.bf16.mxu1 %vm2590_vm0, %v2589_v1 }
 0x150   : > { %2353 = vpow2.f32 %v1909_v13  ;;  %v1910_v17 = vmul.f32 -1.442695, %v591_v16  ;;  %v2096_v18 = vpop.f32.mrb[55].mxu0  ;;  %v1162_v23 = vmul.f32 %v2342_v15, %v1040_v20 }
 0x151   : > { %v2344_v19 = vpop.eup %2343 }
 0x152   : > { %v2346_v22 = vpop.eup %2345  ;;  %2355 = vpow2.f32 %v1910_v17  ;;  %v1163_v24 = vmul.f32 %v2344_v19, %v1045_v21 }
 0x153   : > { %v797_v25 = vadd.f32 1.0, %v2346_v22 }
 0x154   : > { %v2348_v26 = vpop.eup %2347  ;;  %v1193_v27 = vpack.c.bf16 %v1163_v24, %v1162_v23 }
 0x155   : > { %2357 = vrcp.f32 %v797_v25  ;;  %v798_v28 = vadd.f32 1.0, %v2348_v26  ;;  %v596_v29 = vpop.f32.mrb[56].mxu0  ;;  %v1080_v25 = vpop.permute.xlu0 %1079 }
 0x156   : > { %v1911_v30 = vmul.f32 -1.442695, %v596_v29  ;;  %v2099_v31 = vpop.f32.mrb[57].mxu0  ;;  %2170 = vmatmul.mubr.msk.bf16.gmra.mrb[40].mxu1 %vm386_vm1, %v1193_v27  ;;  %v1085_v26 = vpop.permute.xlu1 %1084 }
 0x157   : > { %v2350_v32 = vpop.eup %2349  ;;  %2359 = vrcp.f32 %v798_v28  ;;  %v599_v33 = vpop.f32.mrb[58].mxu0  ;;  %2173 = vmatprep.mubr.msk.bf16.mxu1 %vm2590_vm0, %v2589_v1 }
 0x158   : > { %2361 = vpow2.f32 %v1911_v30  ;;  %v1912_v34 = vmul.f32 -1.442695, %v599_v33  ;;  %v2100_v35 = vpop.f32.mrb[59].mxu0  ;;  %v1164_v40 = vmul.f32 %v2350_v32, %v1050_v37 }
 0x159   : > { %v2352_v36 = vpop.eup %2351 }
 0x15a   : > { %v2354_v39 = vpop.eup %2353  ;;  %2363 = vpow2.f32 %v1912_v34  ;;  %v1165_v41 = vmul.f32 %v2352_v36, %v1055_v38 }
 0x15b   : > { %v799_v42 = vadd.f32 1.0, %v2354_v39 }
 0x15c   : > { %v2356_v43 = vpop.eup %2355  ;;  %v1194_v44 = vpack.c.bf16 %v1165_v41, %v1164_v40 }
 0x15d   : > { %2365 = vrcp.f32 %v799_v42  ;;  %v800_v45 = vadd.f32 1.0, %v2356_v43  ;;  %v604_v46 = vpop.f32.mrb[60].mxu0  ;;  %v1090_v42 = vpop.permute.xlu0 %1089 }
 0x15e   : > { %v1913_v47 = vmul.f32 -1.442695, %v604_v46  ;;  %v2103_v48 = vpop.f32.mrb[61].mxu0  ;;  %2174 = vmatmul.mubr.msk.bf16.gmra.mrb[44].mxu1 %vm386_vm1, %v1194_v44  ;;  %v1095_v43 = vpop.permute.xlu1 %1094 }
 0x15f   : > { %v2358_v49 = vpop.eup %2357  ;;  %2367 = vrcp.f32 %v800_v45  ;;  %v607_v50 = vpop.f32.mrb[62].mxu0  ;;  %2177 = vmatprep.mubr.msk.bf16.mxu1 %vm2590_vm0, %v2589_v1 }
 0x160   : > { %2369 = vpow2.f32 %v1913_v47  ;;  %v1914_v51 = vmul.f32 -1.442695, %v607_v50  ;;  %v2104_v52 = vpop.f32.mrb[63].mxu0  ;;  %v1166_v57 = vmul.f32 %v2358_v49, %v1060_v54 }
 0x161   : > { %v2360_v53 = vpop.eup %2359 }
 0x162   : > { %v2362_v56 = vpop.eup %2361  ;;  %2371 = vpow2.f32 %v1914_v51  ;;  %v1167_v58 = vmul.f32 %v2360_v53, %v1065_v55 }
 0x163   : > { %v801_v59 = vadd.f32 1.0, %v2362_v56 }
 0x164   : > { %v2364_v60 = vpop.eup %2363  ;;  %v1195_v61 = vpack.c.bf16 %v1167_v58, %v1166_v57 }
 0x165   : > { %2373 = vrcp.f32 %v801_v59  ;;  %v802_v62 = vadd.f32 1.0, %v2364_v60  ;;  %v612_v63 = vpop.f32.mrb[64].mxu0  ;;  %v1100_v59 = vpop.permute.xlu0 %1099 }
 0x166   : > { %v1915_v0 = vmul.f32 -1.442695, %v612_v63  ;;  %v2107_v2 = vpop.f32.mrb[65].mxu0  ;;  %2178 = vmatmul.mubr.msk.bf16.gmra.mrb[48].mxu1 %vm386_vm1, %v1195_v61  ;;  %v1105_v60 = vpop.permute.xlu1 %1104 }
 0x167   : > { %v2366_v3 = vpop.eup %2365  ;;  %2375 = vrcp.f32 %v802_v62  ;;  %v615_v4 = vpop.f32.mrb[66].mxu0  ;;  %2181 = vmatprep.mubr.msk.bf16.mxu1 %vm2590_vm0, %v2589_v1 }
 0x168   : > { %2377 = vpow2.f32 %v1915_v0  ;;  %v1916_v5 = vmul.f32 -1.442695, %v615_v4  ;;  %v2108_v6 = vpop.f32.mrb[67].mxu0  ;;  %v1168_v11 = vmul.f32 %v2366_v3, %v1070_v8 }
 0x169   : > { %v2368_v7 = vpop.eup %2367 }
 0x16a   : > { %v2370_v10 = vpop.eup %2369  ;;  %2379 = vpow2.f32 %v1916_v5  ;;  %v1169_v12 = vmul.f32 %v2368_v7, %v1075_v9 }
 0x16b   : > { %v803_v13 = vadd.f32 1.0, %v2370_v10 }
 0x16c   : > { %v2372_v14 = vpop.eup %2371  ;;  %v1196_v15 = vpack.c.bf16 %v1169_v12, %v1168_v11  ;;  %v1110_v12 = vpop.permute.xlu0 %1109 }
 0x16d   : > { %2381 = vrcp.f32 %v803_v13  ;;  %v804_v16 = vadd.f32 1.0, %v2372_v14  ;;  %v620_v17 = vpop.f32.mrb[68].mxu0  ;;  %v1115_v13 = vpop.permute.xlu1 %1114 }
 0x16e   : > { %v1917_v18 = vmul.f32 -1.442695, %v620_v17  ;;  %v2111_v19 = vpop.f32.mrb[69].mxu0  ;;  %2182 = vmatmul.mubr.msk.bf16.gmra.mrb[52].mxu1 %vm386_vm1, %v1196_v15 }
 0x16f   : > { %v2374_v20 = vpop.eup %2373  ;;  %2383 = vrcp.f32 %v804_v16  ;;  %v623_v21 = vpop.f32.mrb[70].mxu0  ;;  %2185 = vmatprep.mubr.msk.bf16.mxu1 %vm2590_vm0, %v2589_v1 }
 0x170   : > { %2385 = vpow2.f32 %v1917_v18  ;;  %v1918_v22 = vmul.f32 -1.442695, %v623_v21  ;;  %v2112_v23 = vpop.f32.mrb[71].mxu0  ;;  %v1170_v28 = vmul.f32 %v2374_v20, %v1080_v25 }
 0x171   : > { %v2376_v24 = vpop.eup %2375  ;;  %v1120_v23 = vpop.permute.xlu0 %1119 }
 0x172   : > { %v2378_v27 = vpop.eup %2377  ;;  %2387 = vpow2.f32 %v1918_v22  ;;  %v1171_v29 = vmul.f32 %v2376_v24, %v1085_v26  ;;  %v1125_v24 = vpop.permute.xlu1 %1124 }
 0x173   : > { %v805_v30 = vadd.f32 1.0, %v2378_v27 }
 0x174   : > { %v2380_v31 = vpop.eup %2379  ;;  %v1197_v32 = vpack.c.bf16 %v1171_v29, %v1170_v28 }
 0x175   : > { %2389 = vrcp.f32 %v805_v30  ;;  %v806_v33 = vadd.f32 1.0, %v2380_v31  ;;  %v628_v34 = vpop.f32.mrb[72].mxu0 }
 0x176   : > { %v1919_v35 = vmul.f32 -1.442695, %v628_v34  ;;  %v2115_v36 = vpop.f32.mrb[73].mxu0  ;;  %2186 = vmatmul.mubr.msk.bf16.gmra.mrb[56].mxu1 %vm386_vm1, %v1197_v32  ;;  %v1130_v32 = vpop.permute.xlu0 %1129 }
 0x177   : > { %v2382_v37 = vpop.eup %2381  ;;  %2391 = vrcp.f32 %v806_v33  ;;  %v631_v38 = vpop.f32.mrb[74].mxu0  ;;  %2189 = vmatprep.mubr.msk.bf16.mxu1 %vm2590_vm0, %v2589_v1 }
 0x178   : > { %2393 = vpow2.f32 %v1919_v35  ;;  %v1920_v39 = vmul.f32 -1.442695, %v631_v38  ;;  %v2116_v40 = vpop.f32.mrb[75].mxu0  ;;  %v1172_v45 = vmul.f32 %v2382_v37, %v1090_v42  ;;  %v1135_v33 = vpop.permute.xlu1 %1134 }
 0x179   : > { %v2384_v41 = vpop.eup %2383 }
 0x17a   : > { %v2386_v44 = vpop.eup %2385  ;;  %2395 = vpow2.f32 %v1920_v39  ;;  %v1173_v46 = vmul.f32 %v2384_v41, %v1095_v43  ;;  %v1140_v38 = vpop.permute.xlu0 %1139  ;;  %v2927_v41 = vld [vmem:[%s3024_s4] ss:$0 sm:$0xff] }
 0x17b   : > { %v807_v47 = vadd.f32 1.0, %v2386_v44 }
 0x17c   : > { %v2388_v48 = vpop.eup %2387  ;;  %v1198_v49 = vpack.c.bf16 %v1173_v46, %v1172_v45 }
 0x17d   : > { %2397 = vrcp.f32 %v807_v47  ;;  %v808_v50 = vadd.f32 1.0, %v2388_v48  ;;  %v636_v51 = vpop.f32.mrb[76].mxu0 }
 0x17e   : > { %v1921_v52 = vmul.f32 -1.442695, %v636_v51  ;;  %v2119_v53 = vpop.f32.mrb[77].mxu0  ;;  %2190 = vmatmul.mubr.msk.bf16.gmra.mrb[60].mxu1 %vm386_vm1, %v1198_v49 }
 0x17f   : > { %v2390_v54 = vpop.eup %2389  ;;  %2399 = vrcp.f32 %v808_v50  ;;  %v639_v55 = vpop.f32.mrb[78].mxu0  ;;  %2193 = vmatprep.mubr.msk.bf16.mxu1 %vm2590_vm0, %v2589_v1 }
 0x180   : > { %2401 = vpow2.f32 %v1921_v52  ;;  %v1922_v56 = vmul.f32 -1.442695, %v639_v55  ;;  %v2120_v57 = vpop.f32.mrb[79].mxu0  ;;  %v1174_v62 = vmul.f32 %v2390_v54, %v1100_v59 }
 0x181   : > { %v2392_v58 = vpop.eup %2391 }
 0x182   : > { %v2394_v61 = vpop.eup %2393  ;;  %2403 = vpow2.f32 %v1922_v56  ;;  %v1175_v63 = vmul.f32 %v2392_v58, %v1105_v60 }
 0x183   : > { %v809_v0 = vadd.f32 1.0, %v2394_v61 }
 0x184   : > { %v2396_v2 = vpop.eup %2395  ;;  %v1199_v3 = vpack.c.bf16 %v1175_v63, %v1174_v62 }
 0x185   : > { %2405 = vrcp.f32 %v809_v0  ;;  %v810_v4 = vadd.f32 1.0, %v2396_v2  ;;  %v644_v5 = vpop.f32.mrb[80].mxu0 }
 0x186   : > { %v1923_v6 = vmul.f32 -1.442695, %v644_v5  ;;  %v2123_v7 = vpop.f32.mrb[81].mxu0  ;;  %2194 = vmatmul.mubr.msk.bf16.gmra.mrb[64].mxu1 %vm386_vm1, %v1199_v3 }
 0x187   : > { %v2398_v8 = vpop.eup %2397  ;;  %2407 = vrcp.f32 %v810_v4  ;;  %v647_v9 = vpop.f32.mrb[82].mxu0  ;;  %2197 = vmatprep.mubr.msk.bf16.mxu1 %vm2590_vm0, %v2589_v1 }
 0x188   : > { %2409 = vpow2.f32 %v1923_v6  ;;  %v2124_v10 = vpop.f32.mrb[83].mxu0  ;;  %v1176_v15 = vmul.f32 %v2398_v8, %v1110_v12 }
 0x189   : > { %v2400_v11 = vpop.eup %2399 }
 0x18a   : > { %v2402_v14 = vpop.eup %2401  ;;  %v1177_v16 = vmul.f32 %v2400_v11, %v1115_v13 }
 0x18b   : > { %v811_v17 = vadd.f32 1.0, %v2402_v14 }
 0x18c   : > { %v2404_v18 = vpop.eup %2403  ;;  %v1200_v19 = vpack.c.bf16 %v1177_v16, %v1176_v15 }
 0x18d   : > { %2411 = vrcp.f32 %v811_v17  ;;  %v812_v20 = vadd.f32 1.0, %v2404_v18 }
 0x18e   : > { %2198 = vmatmul.mubr.msk.bf16.gmra.mrb[68].mxu1 %vm386_vm1, %v1200_v19 }
 0x18f   : > { %v2406_v21 = vpop.eup %2405  ;;  %2413 = vrcp.f32 %v812_v20  ;;  %2201 = vmatprep.mubr.msk.bf16.mxu1 %vm2590_vm0, %v2589_v1 }
 0x190   : > { %v1178_v26 = vmul.f32 %v2406_v21, %v1120_v23 }
 0x191   : > { %v2408_v22 = vpop.eup %2407 }
 0x192   : > { %v2410_v25 = vpop.eup %2409  ;;  %v1179_v27 = vmul.f32 %v2408_v22, %v1125_v24 }
 0x193   : > { %v813_v28 = vadd.f32 1.0, %v2410_v25 }
 0x194   : > { %v1201_v29 = vpack.c.bf16 %v1179_v27, %v1178_v26 }
 0x195   : > { %2415 = vrcp.f32 %v813_v28 }
 0x196   : > { %2202 = vmatmul.mubr.msk.bf16.gmra.mrb[72].mxu1 %vm386_vm1, %v1201_v29 }
 0x197   : > { %v2412_v30 = vpop.eup %2411  ;;  %2205 = vmatprep.mubr.msk.bf16.mxu1 %vm2590_vm0, %v2589_v1 }
 0x198   : > { %v1180_v34 = vmul.f32 %v2412_v30, %v1130_v32 }
 0x199   : > { %v2414_v31 = vpop.eup %2413 }
 0x19a   : > { %v1181_v35 = vmul.f32 %v2414_v31, %v1135_v33 }
 0x19c   : > { %v1202_v36 = vpack.c.bf16 %v1181_v35, %v1180_v34 }
 0x19e   : > { %2206 = vmatmul.mubr.msk.bf16.gmra.mrb[76].mxu1 %vm386_vm1, %v1202_v36 }
 0x19f   : > { %v2416_v37 = vpop.eup %2415  ;;  %2209 = vmatprep.mubr.msk.bf16.mxu1 %vm2590_vm0, %v2589_v1 }
 0x1a0   : > { %v1182_v39 = vmul.f32 %v2416_v37, %v1140_v38 }
 0x1a2   : > { %v1203_v40 = vpack.c.bf16 %v1182_v39, %v1182_v39 }
 0x1a6   : > { %2210 = vmatmul.mubr.msk.bf16.gmra.mrb[80].mxu1 %vm386_vm1, %v1203_v40 }
 0x1d9   : > { %v1324_v42 = vpop.f32.mrb[0].mxu1 }
 0x1da   : > { %v1325_v43 = vadd.f32 %v2927_v41, %v1324_v42  ;;  %v2131_v44 = vpop.f32.mrb[1].mxu1 }
 0x1db   : > { %v1327_v45 = vpop.f32.mrb[2].mxu1 }
 0x1dc   : > { %v1948_v46 = vmul.f32 -1.442695, %v1325_v43  ;;  %v1328_v47 = vadd.f32 %v2927_v41, %v1327_v45  ;;  %v2132_v48 = vpop.f32.mrb[3].mxu1 }
 0x1de   : > { %2417 = vpow2.f32 %v1948_v46  ;;  %v1949_v1 = vmul.f32 -1.442695, %v1328_v47 }
 0x1e0   : > { %2419 = vpow2.f32 %v1949_v1 }
 0x1e1   : > { %v1332_v49 = vpop.f32.mrb[4].mxu1 }
 0x1e2   : > { %v1333_v50 = vadd.f32 %v2927_v41, %v1332_v49  ;;  %v2135_v51 = vpop.f32.mrb[5].mxu1 }
 0x1e3   : > { %v1335_v52 = vpop.f32.mrb[6].mxu1 }
 0x1e4   : > { %v1950_v53 = vmul.f32 -1.442695, %v1333_v50  ;;  %v1336_v54 = vadd.f32 %v2927_v41, %v1335_v52  ;;  %v2136_v55 = vpop.f32.mrb[7].mxu1 }
 0x1e6   : > { %2421 = vpow2.f32 %v1950_v53  ;;  %v1951_v56 = vmul.f32 -1.442695, %v1336_v54 }
 0x1e8   : > { %v2418_v57 = vpop.eup %2417  ;;  %2423 = vpow2.f32 %v1951_v56 }
 0x1e9   : > { %v1613_v58 = vadd.f32 1.0, %v2418_v57  ;;  %v1340_v59 = vpop.f32.mrb[8].mxu1 }
 0x1ea   : > { %v2420_v60 = vpop.eup %2419  ;;  %v1341_v61 = vadd.f32 %v2927_v41, %v1340_v59  ;;  %v2139_v62 = vpop.f32.mrb[9].mxu1 }
 0x1eb   : > { %2425 = vrcp.f32 %v1613_v58  ;;  %v1614_v63 = vadd.f32 1.0, %v2420_v60  ;;  %v1343_v0 = vpop.f32.mrb[10].mxu1 }
 0x1ec   : > { %v1952_v2 = vmul.f32 -1.442695, %v1341_v61  ;;  %v1344_v3 = vadd.f32 %v2927_v41, %v1343_v0  ;;  %v2140_v4 = vpop.f32.mrb[11].mxu1 }
 0x1ed   : > { %2427 = vrcp.f32 %v1614_v63 }
 0x1ee   : > { %2429 = vpow2.f32 %v1952_v2  ;;  %v1953_v5 = vmul.f32 -1.442695, %v1344_v3 }
 0x1f0   : > { %v2422_v6 = vpop.eup %2421  ;;  %2431 = vpow2.f32 %v1953_v5 }
 0x1f1   : > { %v1615_v7 = vadd.f32 1.0, %v2422_v6  ;;  %v1348_v8 = vpop.f32.mrb[12].mxu1 }
 0x1f2   : > { %v2424_v9 = vpop.eup %2423  ;;  %v1349_v10 = vadd.f32 %v2927_v41, %v1348_v8  ;;  %v2143_v11 = vpop.f32.mrb[13].mxu1 }
 0x1f3   : > { %2433 = vrcp.f32 %v1615_v7  ;;  %v1616_v12 = vadd.f32 1.0, %v2424_v9  ;;  %v1351_v13 = vpop.f32.mrb[14].mxu1 }
 0x1f4   : > { %v1954_v14 = vmul.f32 -1.442695, %v1349_v10  ;;  %v1352_v15 = vadd.f32 %v2927_v41, %v1351_v13  ;;  %v2144_v16 = vpop.f32.mrb[15].mxu1 }
 0x1f5   : > { %v2426_v17 = vpop.eup %2425  ;;  %2435 = vrcp.f32 %v1616_v12 }
 0x1f6   : > { %1736 = vst [vmem:[%s2940_s29] sm:$0xff] %v2426_v17  ;;  %2437 = vpow2.f32 %v1954_v14  ;;  %v1955_v18 = vmul.f32 -1.442695, %v1352_v15 }
 0x1f7   : > { %v2428_v19 = vpop.eup %2427 }
 0x1f8   : > { %v2430_v20 = vpop.eup %2429  ;;  %1737 = vst [vmem:[%s2940_s29 + $0x8] sm:$0xff] %v2428_v19  ;;  %2439 = vpow2.f32 %v1955_v18 }
 0x1f9   : > { %v1617_v21 = vadd.f32 1.0, %v2430_v20  ;;  %v1356_v22 = vpop.f32.mrb[16].mxu1 }
 0x1fa   : > { %v2432_v23 = vpop.eup %2431  ;;  %v1357_v24 = vadd.f32 %v2927_v41, %v1356_v22  ;;  %v2147_v25 = vpop.f32.mrb[17].mxu1 }
 0x1fb   : > { %2441 = vrcp.f32 %v1617_v21  ;;  %v1618_v26 = vadd.f32 1.0, %v2432_v23  ;;  %v1359_v27 = vpop.f32.mrb[18].mxu1 }
 0x1fc   : > { %v1956_v28 = vmul.f32 -1.442695, %v1357_v24  ;;  %v1360_v29 = vadd.f32 %v2927_v41, %v1359_v27  ;;  %v2148_v30 = vpop.f32.mrb[19].mxu1 }
 0x1fd   : > { %v2434_v31 = vpop.eup %2433  ;;  %2443 = vrcp.f32 %v1618_v26 }
 0x1fe   : > { %1738 = vst [vmem:[%s2940_s29 + $0x10] sm:$0xff] %v2434_v31  ;;  %2445 = vpow2.f32 %v1956_v28  ;;  %v1957_v32 = vmul.f32 -1.442695, %v1360_v29 }
 0x1ff   : > { %v2436_v33 = vpop.eup %2435 }
 0x200   : > { %v2438_v34 = vpop.eup %2437  ;;  %1739 = vst [vmem:[%s2940_s29 + $0x18] sm:$0xff] %v2436_v33  ;;  %2447 = vpow2.f32 %v1957_v32 }
 0x201   : > { %v1619_v35 = vadd.f32 1.0, %v2438_v34  ;;  %v1364_v36 = vpop.f32.mrb[20].mxu1 }
 0x202   : > { %v2440_v37 = vpop.eup %2439  ;;  %v1365_v38 = vadd.f32 %v2927_v41, %v1364_v36  ;;  %v2151_v39 = vpop.f32.mrb[21].mxu1 }
 0x203   : > { %2449 = vrcp.f32 %v1619_v35  ;;  %v1620_v40 = vadd.f32 1.0, %v2440_v37  ;;  %v1367_v42 = vpop.f32.mrb[22].mxu1 }
 0x204   : > { %v1958_v43 = vmul.f32 -1.442695, %v1365_v38  ;;  %v1368_v44 = vadd.f32 %v2927_v41, %v1367_v42  ;;  %v2152_v45 = vpop.f32.mrb[23].mxu1 }
 0x205   : > { %v2442_v46 = vpop.eup %2441  ;;  %2451 = vrcp.f32 %v1620_v40 }
 0x206   : > { %1740 = vst [vmem:[%s2940_s29 + $0x20] sm:$0xff] %v2442_v46  ;;  %2453 = vpow2.f32 %v1958_v43  ;;  %v1959_v47 = vmul.f32 -1.442695, %v1368_v44 }
 0x207   : > { %v2444_v48 = vpop.eup %2443 }
 0x208   : > { %v2446_v1 = vpop.eup %2445  ;;  %1741 = vst [vmem:[%s2940_s29 + $0x28] sm:$0xff] %v2444_v48  ;;  %2455 = vpow2.f32 %v1959_v47 }
 0x209   : > { %v1621_v49 = vadd.f32 1.0, %v2446_v1  ;;  %v1372_v50 = vpop.f32.mrb[24].mxu1 }
 0x20a   : > { %v2448_v51 = vpop.eup %2447  ;;  %v1373_v52 = vadd.f32 %v2927_v41, %v1372_v50  ;;  %v2155_v53 = vpop.f32.mrb[25].mxu1 }
 0x20b   : > { %2457 = vrcp.f32 %v1621_v49  ;;  %v1622_v54 = vadd.f32 1.0, %v2448_v51  ;;  %v1375_v55 = vpop.f32.mrb[26].mxu1 }
 0x20c   : > { %v1960_v56 = vmul.f32 -1.442695, %v1373_v52  ;;  %v1376_v57 = vadd.f32 %v2927_v41, %v1375_v55  ;;  %v2156_v58 = vpop.f32.mrb[27].mxu1 }
 0x20d   : > { %v2450_v59 = vpop.eup %2449  ;;  %2459 = vrcp.f32 %v1622_v54 }
 0x20e   : > { %1742 = vst [vmem:[%s2940_s29 + $0x30] sm:$0xff] %v2450_v59  ;;  %2461 = vpow2.f32 %v1960_v56  ;;  %v1961_v60 = vmul.f32 -1.442695, %v1376_v57 }
 0x20f   : > { %v2452_v61 = vpop.eup %2451 }
 0x210   : > { %v2454_v62 = vpop.eup %2453  ;;  %1743 = vst [vmem:[%s2940_s29 + $0x38] sm:$0xff] %v2452_v61  ;;  %2463 = vpow2.f32 %v1961_v60 }
 0x211   : > { %v1623_v63 = vadd.f32 1.0, %v2454_v62  ;;  %v1380_v0 = vpop.f32.mrb[28].mxu1 }
 0x212   : > { %v2456_v2 = vpop.eup %2455  ;;  %v1381_v3 = vadd.f32 %v2927_v41, %v1380_v0  ;;  %v2159_v4 = vpop.f32.mrb[29].mxu1 }
 0x213   : > { %2465 = vrcp.f32 %v1623_v63  ;;  %v1624_v5 = vadd.f32 1.0, %v2456_v2  ;;  %v1383_v6 = vpop.f32.mrb[30].mxu1 }
 0x214   : > { %v1962_v7 = vmul.f32 -1.442695, %v1381_v3  ;;  %v1384_v8 = vadd.f32 %v2927_v41, %v1383_v6  ;;  %v2160_v9 = vpop.f32.mrb[31].mxu1 }
 0x215   : > { %v2458_v10 = vpop.eup %2457  ;;  %2467 = vrcp.f32 %v1624_v5 }
 0x216   : > { %1744 = vst [vmem:[%s2940_s29 + $0x40] sm:$0xff] %v2458_v10  ;;  %2469 = vpow2.f32 %v1962_v7  ;;  %v1963_v11 = vmul.f32 -1.442695, %v1384_v8 }
 0x217   : > { %v2460_v12 = vpop.eup %2459 }
 0x218   : > { %v2462_v13 = vpop.eup %2461  ;;  %1745 = vst [vmem:[%s2940_s29 + $0x48] sm:$0xff] %v2460_v12  ;;  %2471 = vpow2.f32 %v1963_v11 }
 0x219   : > { %v1625_v14 = vadd.f32 1.0, %v2462_v13  ;;  %v1388_v15 = vpop.f32.mrb[32].mxu1 }
 0x21a   : > { %v2464_v16 = vpop.eup %2463  ;;  %v1389_v17 = vadd.f32 %v2927_v41, %v1388_v15  ;;  %v2163_v18 = vpop.f32.mrb[33].mxu1 }
 0x21b   : > { %2473 = vrcp.f32 %v1625_v14  ;;  %v1626_v19 = vadd.f32 1.0, %v2464_v16  ;;  %v1391_v20 = vpop.f32.mrb[34].mxu1 }
 0x21c   : > { %v1964_v21 = vmul.f32 -1.442695, %v1389_v17  ;;  %v1392_v22 = vadd.f32 %v2927_v41, %v1391_v20  ;;  %v2164_v23 = vpop.f32.mrb[35].mxu1 }
 0x21d   : > { %v2466_v24 = vpop.eup %2465  ;;  %2475 = vrcp.f32 %v1626_v19 }
 0x21e   : > { %1746 = vst [vmem:[%s2940_s29 + $0x50] sm:$0xff] %v2466_v24  ;;  %2477 = vpow2.f32 %v1964_v21  ;;  %v1965_v25 = vmul.f32 -1.442695, %v1392_v22 }
 0x21f   : > { %v2468_v26 = vpop.eup %2467 }
 0x220   : > { %v2470_v27 = vpop.eup %2469  ;;  %1747 = vst [vmem:[%s2940_s29 + $0x58] sm:$0xff] %v2468_v26  ;;  %2479 = vpow2.f32 %v1965_v25 }
 0x221   : > { %v1627_v28 = vadd.f32 1.0, %v2470_v27  ;;  %v1396_v29 = vpop.f32.mrb[36].mxu1 }
 0x222   : > { %v2472_v30 = vpop.eup %2471  ;;  %v1397_v31 = vadd.f32 %v2927_v41, %v1396_v29  ;;  %v2167_v32 = vpop.f32.mrb[37].mxu1 }
 0x223   : > { %2481 = vrcp.f32 %v1627_v28  ;;  %v1628_v33 = vadd.f32 1.0, %v2472_v30  ;;  %v1399_v34 = vpop.f32.mrb[38].mxu1 }
 0x224   : > { %v1966_v35 = vmul.f32 -1.442695, %v1397_v31  ;;  %v1400_v36 = vadd.f32 %v2927_v41, %v1399_v34  ;;  %v2168_v37 = vpop.f32.mrb[39].mxu1 }
 0x225   : > { %v2474_v38 = vpop.eup %2473  ;;  %2483 = vrcp.f32 %v1628_v33 }
 0x226   : > { %1748 = vst [vmem:[%s2940_s29 + $0x60] sm:$0xff] %v2474_v38  ;;  %2485 = vpow2.f32 %v1966_v35  ;;  %v1967_v39 = vmul.f32 -1.442695, %v1400_v36 }
 0x227   : > { %v2476_v40 = vpop.eup %2475 }
 0x228   : > { %v2478_v42 = vpop.eup %2477  ;;  %1749 = vst [vmem:[%s2940_s29 + $0x68] sm:$0xff] %v2476_v40  ;;  %2487 = vpow2.f32 %v1967_v39 }
 0x229   : > { %v1629_v43 = vadd.f32 1.0, %v2478_v42  ;;  %v1404_v44 = vpop.f32.mrb[40].mxu1 }
 0x22a   : > { %v2480_v45 = vpop.eup %2479  ;;  %v1405_v46 = vadd.f32 %v2927_v41, %v1404_v44  ;;  %v2171_v47 = vpop.f32.mrb[41].mxu1 }
 0x22b   : > { %2489 = vrcp.f32 %v1629_v43  ;;  %v1630_v48 = vadd.f32 1.0, %v2480_v45  ;;  %v1407_v1 = vpop.f32.mrb[42].mxu1 }
 0x22c   : > { %v1968_v49 = vmul.f32 -1.442695, %v1405_v46  ;;  %v1408_v50 = vadd.f32 %v2927_v41, %v1407_v1  ;;  %v2172_v51 = vpop.f32.mrb[43].mxu1 }
 0x22d   : > { %v2482_v52 = vpop.eup %2481  ;;  %2491 = vrcp.f32 %v1630_v48 }
 0x22e   : > { %1750 = vst [vmem:[%s2940_s29 + $0x70] sm:$0xff] %v2482_v52  ;;  %2493 = vpow2.f32 %v1968_v49  ;;  %v1969_v53 = vmul.f32 -1.442695, %v1408_v50 }
 0x22f   : > { %v2484_v54 = vpop.eup %2483 }
 0x230   : > { %v2486_v55 = vpop.eup %2485  ;;  %1751 = vst [vmem:[%s2940_s29 + $0x78] sm:$0xff] %v2484_v54  ;;  %2495 = vpow2.f32 %v1969_v53 }
 0x231   : > { %v1631_v56 = vadd.f32 1.0, %v2486_v55  ;;  %v1412_v57 = vpop.f32.mrb[44].mxu1 }
 0x232   : > { %v2488_v58 = vpop.eup %2487  ;;  %v1413_v59 = vadd.f32 %v2927_v41, %v1412_v57  ;;  %v2175_v60 = vpop.f32.mrb[45].mxu1 }
 0x233   : > { %2497 = vrcp.f32 %v1631_v56  ;;  %v1632_v61 = vadd.f32 1.0, %v2488_v58  ;;  %v1415_v62 = vpop.f32.mrb[46].mxu1 }
 0x234   : > { %v1970_v63 = vmul.f32 -1.442695, %v1413_v59  ;;  %v1416_v0 = vadd.f32 %v2927_v41, %v1415_v62  ;;  %v2176_v2 = vpop.f32.mrb[47].mxu1 }
 0x235   : > { %v2490_v3 = vpop.eup %2489  ;;  %2499 = vrcp.f32 %v1632_v61 }
 0x236   : > { %1752 = vst [vmem:[%s2940_s29 + $0x80] sm:$0xff] %v2490_v3  ;;  %2501 = vpow2.f32 %v1970_v63  ;;  %v1971_v4 = vmul.f32 -1.442695, %v1416_v0 }
 0x237   : > { %v2492_v5 = vpop.eup %2491 }
 0x238   : > { %v2494_v6 = vpop.eup %2493  ;;  %1753 = vst [vmem:[%s2940_s29 + $0x88] sm:$0xff] %v2492_v5  ;;  %2503 = vpow2.f32 %v1971_v4 }
 0x239   : > { %v1633_v7 = vadd.f32 1.0, %v2494_v6  ;;  %v1420_v8 = vpop.f32.mrb[48].mxu1 }
 0x23a   : > { %v2496_v9 = vpop.eup %2495  ;;  %v1421_v10 = vadd.f32 %v2927_v41, %v1420_v8  ;;  %v2179_v11 = vpop.f32.mrb[49].mxu1 }
 0x23b   : > { %2505 = vrcp.f32 %v1633_v7  ;;  %v1634_v12 = vadd.f32 1.0, %v2496_v9  ;;  %v1423_v13 = vpop.f32.mrb[50].mxu1 }
 0x23c   : > { %v1972_v14 = vmul.f32 -1.442695, %v1421_v10  ;;  %v1424_v15 = vadd.f32 %v2927_v41, %v1423_v13  ;;  %v2180_v16 = vpop.f32.mrb[51].mxu1 }
 0x23d   : > { %v2498_v17 = vpop.eup %2497  ;;  %2507 = vrcp.f32 %v1634_v12 }
 0x23e   : > { %1754 = vst [vmem:[%s2940_s29 + $0x90] sm:$0xff] %v2498_v17  ;;  %2509 = vpow2.f32 %v1972_v14  ;;  %v1973_v18 = vmul.f32 -1.442695, %v1424_v15 }
 0x23f   : > { %v2500_v19 = vpop.eup %2499 }
 0x240   : > { %v2502_v20 = vpop.eup %2501  ;;  %1755 = vst [vmem:[%s2940_s29 + $0x98] sm:$0xff] %v2500_v19  ;;  %2511 = vpow2.f32 %v1973_v18 }
 0x241   : > { %v1635_v21 = vadd.f32 1.0, %v2502_v20  ;;  %v1428_v22 = vpop.f32.mrb[52].mxu1 }
 0x242   : > { %v2504_v23 = vpop.eup %2503  ;;  %v1429_v24 = vadd.f32 %v2927_v41, %v1428_v22  ;;  %v2183_v25 = vpop.f32.mrb[53].mxu1 }
 0x243   : > { %2513 = vrcp.f32 %v1635_v21  ;;  %v1636_v26 = vadd.f32 1.0, %v2504_v23  ;;  %v1431_v27 = vpop.f32.mrb[54].mxu1 }
 0x244   : > { %v1974_v28 = vmul.f32 -1.442695, %v1429_v24  ;;  %v1432_v29 = vadd.f32 %v2927_v41, %v1431_v27  ;;  %v2184_v30 = vpop.f32.mrb[55].mxu1 }
 0x245   : > { %v2506_v31 = vpop.eup %2505  ;;  %2515 = vrcp.f32 %v1636_v26 }
 0x246   : > { %1756 = vst [vmem:[%s2940_s29 + $0xa0] sm:$0xff] %v2506_v31  ;;  %2517 = vpow2.f32 %v1974_v28  ;;  %v1975_v32 = vmul.f32 -1.442695, %v1432_v29 }
 0x247   : > { %v2508_v33 = vpop.eup %2507 }
 0x248   : > { %v2510_v34 = vpop.eup %2509  ;;  %1757 = vst [vmem:[%s2940_s29 + $0xa8] sm:$0xff] %v2508_v33  ;;  %2519 = vpow2.f32 %v1975_v32 }
 0x249   : > { %v1637_v35 = vadd.f32 1.0, %v2510_v34  ;;  %v1436_v36 = vpop.f32.mrb[56].mxu1 }
 0x24a   : > { %v2512_v37 = vpop.eup %2511  ;;  %v1437_v38 = vadd.f32 %v2927_v41, %v1436_v36  ;;  %v2187_v39 = vpop.f32.mrb[57].mxu1 }
 0x24b   : > { %2521 = vrcp.f32 %v1637_v35  ;;  %v1638_v40 = vadd.f32 1.0, %v2512_v37  ;;  %v1439_v42 = vpop.f32.mrb[58].mxu1 }
 0x24c   : > { %v1976_v43 = vmul.f32 -1.442695, %v1437_v38  ;;  %v1440_v44 = vadd.f32 %v2927_v41, %v1439_v42  ;;  %v2188_v45 = vpop.f32.mrb[59].mxu1 }
 0x24d   : > { %v2514_v46 = vpop.eup %2513  ;;  %2523 = vrcp.f32 %v1638_v40 }
 0x24e   : > { %1758 = vst [vmem:[%s2940_s29 + $0xb0] sm:$0xff] %v2514_v46  ;;  %2525 = vpow2.f32 %v1976_v43  ;;  %v1977_v47 = vmul.f32 -1.442695, %v1440_v44 }
 0x24f   : > { %v2516_v48 = vpop.eup %2515 }
 0x250   : > { %v2518_v1 = vpop.eup %2517  ;;  %1759 = vst [vmem:[%s2940_s29 + $0xb8] sm:$0xff] %v2516_v48  ;;  %2527 = vpow2.f32 %v1977_v47 }
 0x251   : > { %v1639_v49 = vadd.f32 1.0, %v2518_v1  ;;  %v1444_v50 = vpop.f32.mrb[60].mxu1 }
 0x252   : > { %v2520_v51 = vpop.eup %2519  ;;  %v1445_v52 = vadd.f32 %v2927_v41, %v1444_v50  ;;  %v2191_v53 = vpop.f32.mrb[61].mxu1 }
 0x253   : > { %2529 = vrcp.f32 %v1639_v49  ;;  %v1640_v54 = vadd.f32 1.0, %v2520_v51  ;;  %v1447_v55 = vpop.f32.mrb[62].mxu1 }
 0x254   : > { %v1978_v56 = vmul.f32 -1.442695, %v1445_v52  ;;  %v1448_v57 = vadd.f32 %v2927_v41, %v1447_v55  ;;  %v2192_v58 = vpop.f32.mrb[63].mxu1 }
 0x255   : > { %v2522_v59 = vpop.eup %2521  ;;  %2531 = vrcp.f32 %v1640_v54 }
 0x256   : > { %1760 = vst [vmem:[%s2940_s29 + $0xc0] sm:$0xff] %v2522_v59  ;;  %2533 = vpow2.f32 %v1978_v56  ;;  %v1979_v60 = vmul.f32 -1.442695, %v1448_v57 }
 0x257   : > { %v2524_v61 = vpop.eup %2523 }
 0x258   : > { %v2526_v62 = vpop.eup %2525  ;;  %1761 = vst [vmem:[%s2940_s29 + $0xc8] sm:$0xff] %v2524_v61  ;;  %2535 = vpow2.f32 %v1979_v60 }
 0x259   : > { %v1641_v63 = vadd.f32 1.0, %v2526_v62  ;;  %v1452_v0 = vpop.f32.mrb[64].mxu1 }
 0x25a   : > { %v2528_v2 = vpop.eup %2527  ;;  %v1453_v3 = vadd.f32 %v2927_v41, %v1452_v0  ;;  %v2195_v4 = vpop.f32.mrb[65].mxu1 }
 0x25b   : > { %2537 = vrcp.f32 %v1641_v63  ;;  %v1642_v5 = vadd.f32 1.0, %v2528_v2  ;;  %v1455_v6 = vpop.f32.mrb[66].mxu1 }
 0x25c   : > { %v1980_v7 = vmul.f32 -1.442695, %v1453_v3  ;;  %v1456_v8 = vadd.f32 %v2927_v41, %v1455_v6  ;;  %v2196_v9 = vpop.f32.mrb[67].mxu1 }
 0x25d   : > { %v2530_v10 = vpop.eup %2529  ;;  %2539 = vrcp.f32 %v1642_v5 }
 0x25e   : > { %1762 = vst [vmem:[%s2940_s29 + $0xd0] sm:$0xff] %v2530_v10  ;;  %2541 = vpow2.f32 %v1980_v7  ;;  %v1981_v11 = vmul.f32 -1.442695, %v1456_v8 }
 0x25f   : > { %v2532_v12 = vpop.eup %2531 }
 0x260   : > { %v2534_v13 = vpop.eup %2533  ;;  %1763 = vst [vmem:[%s2940_s29 + $0xd8] sm:$0xff] %v2532_v12  ;;  %2543 = vpow2.f32 %v1981_v11 }
 0x261   : > { %v1643_v14 = vadd.f32 1.0, %v2534_v13  ;;  %v1460_v15 = vpop.f32.mrb[68].mxu1 }
 0x262   : > { %v2536_v16 = vpop.eup %2535  ;;  %v1461_v17 = vadd.f32 %v2927_v41, %v1460_v15  ;;  %v2199_v18 = vpop.f32.mrb[69].mxu1 }
 0x263   : > { %2545 = vrcp.f32 %v1643_v14  ;;  %v1644_v19 = vadd.f32 1.0, %v2536_v16  ;;  %v1463_v20 = vpop.f32.mrb[70].mxu1 }
 0x264   : > { %v1982_v21 = vmul.f32 -1.442695, %v1461_v17  ;;  %v1464_v22 = vadd.f32 %v2927_v41, %v1463_v20  ;;  %v2200_v23 = vpop.f32.mrb[71].mxu1 }
 0x265   : > { %v2538_v24 = vpop.eup %2537  ;;  %2547 = vrcp.f32 %v1644_v19 }
 0x266   : > { %1764 = vst [vmem:[%s2940_s29 + $0xe0] sm:$0xff] %v2538_v24  ;;  %2549 = vpow2.f32 %v1982_v21  ;;  %v1983_v25 = vmul.f32 -1.442695, %v1464_v22 }
 0x267   : > { %v2540_v26 = vpop.eup %2539 }
 0x268   : > { %v2542_v27 = vpop.eup %2541  ;;  %1765 = vst [vmem:[%s2940_s29 + $0xe8] sm:$0xff] %v2540_v26  ;;  %2551 = vpow2.f32 %v1983_v25 }
 0x269   : > { %v1645_v28 = vadd.f32 1.0, %v2542_v27  ;;  %v1468_v29 = vpop.f32.mrb[72].mxu1 }
 0x26a   : > { %v2544_v30 = vpop.eup %2543  ;;  %v1469_v31 = vadd.f32 %v2927_v41, %v1468_v29  ;;  %v2203_v32 = vpop.f32.mrb[73].mxu1 }
 0x26b   : > { %2553 = vrcp.f32 %v1645_v28  ;;  %v1646_v33 = vadd.f32 1.0, %v2544_v30  ;;  %v1471_v34 = vpop.f32.mrb[74].mxu1 }
 0x26c   : > { %v1984_v35 = vmul.f32 -1.442695, %v1469_v31  ;;  %v1472_v36 = vadd.f32 %v2927_v41, %v1471_v34  ;;  %v2204_v37 = vpop.f32.mrb[75].mxu1 }
 0x26d   : > { %v2546_v38 = vpop.eup %2545  ;;  %2555 = vrcp.f32 %v1646_v33 }
 0x26e   : > { %1766 = vst [vmem:[%s2940_s29 + $0xf0] sm:$0xff] %v2546_v38  ;;  %2557 = vpow2.f32 %v1984_v35  ;;  %v1985_v39 = vmul.f32 -1.442695, %v1472_v36 }
 0x26f   : > { %v2548_v40 = vpop.eup %2547 }
 0x270   : > { %v2550_v42 = vpop.eup %2549  ;;  %1767 = vst [vmem:[%s2940_s29 + $0xf8] sm:$0xff] %v2548_v40  ;;  %2559 = vpow2.f32 %v1985_v39 }
 0x271   : > { %v1647_v43 = vadd.f32 1.0, %v2550_v42  ;;  %v1476_v44 = vpop.f32.mrb[76].mxu1 }
 0x272   : > { %v2552_v45 = vpop.eup %2551  ;;  %v1477_v46 = vadd.f32 %v2927_v41, %v1476_v44  ;;  %v2207_v47 = vpop.f32.mrb[77].mxu1 }
 0x273   : > { %2561 = vrcp.f32 %v1647_v43  ;;  %v1648_v48 = vadd.f32 1.0, %v2552_v45  ;;  %v1479_v1 = vpop.f32.mrb[78].mxu1 }
 0x274   : > { %v1986_v49 = vmul.f32 -1.442695, %v1477_v46  ;;  %v1480_v50 = vadd.f32 %v2927_v41, %v1479_v1  ;;  %v2208_v51 = vpop.f32.mrb[79].mxu1 }
 0x275   : > { %v2554_v52 = vpop.eup %2553  ;;  %2563 = vrcp.f32 %v1648_v48 }
 0x276   : > { %1768 = vst [vmem:[%s2940_s29 + $0x100] sm:$0xff] %v2554_v52  ;;  %2565 = vpow2.f32 %v1986_v49  ;;  %v1987_v53 = vmul.f32 -1.442695, %v1480_v50 }
 0x277   : > { %v2556_v54 = vpop.eup %2555 }
 0x278   : > { %v2558_v55 = vpop.eup %2557  ;;  %1769 = vst [vmem:[%s2940_s29 + $0x108] sm:$0xff] %v2556_v54  ;;  %2567 = vpow2.f32 %v1987_v53 }
 0x279   : > { %v1649_v56 = vadd.f32 1.0, %v2558_v55  ;;  %v1484_v57 = vpop.f32.mrb[80].mxu1 }
 0x27a   : > { %v2560_v58 = vpop.eup %2559  ;;  %v1485_v59 = vadd.f32 %v2927_v41, %v1484_v57  ;;  %v2211_v60 = vpop.f32.mrb[81].mxu1 }
 0x27b   : > { %2569 = vrcp.f32 %v1649_v56  ;;  %v1650_v61 = vadd.f32 1.0, %v2560_v58  ;;  %v1487_v62 = vpop.f32.mrb[82].mxu1 }
 0x27c   : > { %v1988_v63 = vmul.f32 -1.442695, %v1485_v59  ;;  %v2212_v0 = vpop.f32.mrb[83].mxu1 }
 0x27d   : > { %v2562_v2 = vpop.eup %2561  ;;  %2571 = vrcp.f32 %v1650_v61 }
 0x27e   : > { %1770 = vst [vmem:[%s2940_s29 + $0x110] sm:$0xff] %v2562_v2  ;;  %2573 = vpow2.f32 %v1988_v63 }
 0x27f   : > { %v2564_v3 = vpop.eup %2563 }
 0x280   : > { %v2566_v4 = vpop.eup %2565  ;;  %1771 = vst [vmem:[%s2940_s29 + $0x118] sm:$0xff] %v2564_v3 }
 0x281   : > { %v1651_v5 = vadd.f32 1.0, %v2566_v4 }
 0x282   : > { %v2568_v6 = vpop.eup %2567 }
 0x283   : > { %2575 = vrcp.f32 %v1651_v5  ;;  %v1652_v41 = vadd.f32 1.0, %v2568_v6 }
 0x285   : > { %v2570_v7 = vpop.eup %2569  ;;  %2577 = vrcp.f32 %v1652_v41 }
 0x286   : > { %1772 = vst [vmem:[%s2940_s29 + $0x120] sm:$0xff] %v2570_v7 }
 0x287   : > { %v2572_v8 = vpop.eup %2571 }
 0x288   : > { %v2574_v9 = vpop.eup %2573  ;;  %1773 = vst [vmem:[%s2940_s29 + $0x128] sm:$0xff] %v2572_v8 }
 0x289   : > { %v1653_v10 = vadd.f32 1.0, %v2574_v9 }
 0x28b   : > { %2579 = vrcp.f32 %v1653_v10 }
 0x28d   : > { %v2576_v11 = vpop.eup %2575 }
 0x28e   : > { %1774 = vst [vmem:[%s2940_s29 + $0x130] sm:$0xff] %v2576_v11 }
 0x28f   : > { %v2578_v12 = vpop.eup %2577 }
 0x290   : > { %1775 = vst [vmem:[%s2940_s29 + $0x138] sm:$0xff] %v2578_v12 }
 0x295   : > { %v2580_v13 = vpop.eup %2579 }
 0x296   : > { %1776 = vst [vmem:[%s2940_s29 + $0x140] sm:$0xff] %v2580_v13 }
 0x297 PF: > { %s15_s18 = sadd.s32 1, %s2587_s18  }
 0x298   : > { %p12_p4 = scmp.ge.s32.totalorder %s15_s18, 4  }
 0x29a   :  { %14 = sbr.rel (!%p12_p4) target bundleno = 1 (0x1), region = 70 }

</bundles_post_ra>
